<compile_context>
chip_gen: v7x
topology: tpu7x:2x2x1
jax: 0.10.0
libtpu: 0.0.40
codegen_flags: <defaults>
</compile_context>

<pallas_src>
import numpy as np

import jax
import jax.numpy as jnp
from jax import lax
from jax.experimental import pallas as pl
from jax.experimental.pallas import tpu as pltpu


# ----------------------------------------------------------------------------
# The fused Pallas kernel
# ----------------------------------------------------------------------------

def _net_kernel(x_ref, w1p_ref, b1_ref, w2p_ref, b2_ref, sel1_ref, sel2_ref,
                fc1_wp_ref, fc1_b_ref, fc2_wp_ref, fc2_b_ref, o_ref):
    """Whole Net forward. Shapes (K = 5 conv kernel, B = batch):
      x_ref      (B, 32, 32)   input images (channel dim squeezed in the wrapper)
      w1p_ref    (160, 140)    conv1 weights: row ki*32+w, col co*28+j (ki,w folded into K)
      b1_ref     (1, 140)      conv1 bias per output lane
      w2p_ref    (350, 70)     conv2 weights: row ki*70+ci*14+w, col co*10+j
      b2_ref     (1, 70)       conv2 bias per output lane
      sel1_ref   (139, 70)     block-diagonal 0/1 even-lane pool selector, stage 1
      sel2_ref   (69, 35)      block-diagonal 0/1 even-lane pool selector, stage 2
      fc1_wp_ref (175, 50)     fc1 weights, rows permuted to the kernel's (h, co, w) order
      fc1_b_ref  (1, 50)
      fc2_wp_ref (50, 128)     fc2 weights transposed + zero-padded to 128 lanes
      fc2_b_ref  (1, 128)
      o_ref      (B, 128)      padded logits (first 10 lanes valid)
    """
    f32 = jnp.float32
    bsz = x_ref.shape[0]
    K = 5

    w1p, b1 = w1p_ref[...], b1_ref[...]
    w2p, b2 = w2p_ref[...], b2_ref[...]
    sel1, sel2 = sel1_ref[...], sel2_ref[...]

    def relu_pool(y, sel, rows):
        """y: (rows, C*w) conv rows, channels lane-concatenated -> ReLU -> 2x2 max-pool."""
        y = jnp.maximum(y, 0.0)
        # Lane pairs: shifted-slice max (lane shift = XLU, max = VPU), then ONE exact 0/1
        # block-diagonal selector matmul keeps the even lane of each within-channel pair.
        m = jnp.maximum(y[:, :-1], y[:, 1:])
        m = jnp.dot(m, sel, preferred_element_type=f32)
        # Sublane pairs: minor-dim-preserving regroup + max (lane dim untouched).
        r = m.reshape(rows // 2, 2, m.shape[-1])
        return jnp.maximum(r[:, 0, :], r[:, 1, :])

    z_rows = []
    for b in range(bsz):   # static unroll; tiny trip count (see batch-grid note at top)
        # ---- conv1 (1->5, 5x5 VALID) + ReLU + 2x2 pool: ONE GEMM ---------------------
        slab1 = jnp.concatenate(
            [x_ref[b, pl.ds(ki, 28), :] for ki in range(K)], axis=-1)        # (28, 160)
        y1 = jnp.dot(slab1, w1p, preferred_element_type=f32) + b1            # (28, 140)
        a1 = relu_pool(y1, sel1, 28)                                         # (14, 70) [h, ci*14+w]
        # ---- conv2 (5->7, 5x5 VALID) + ReLU + 2x2 pool: ONE GEMM ---------------------
        slab2 = jnp.concatenate(
            [a1[ki:ki + 10, :] for ki in range(K)], axis=-1)                 # (10, 350)
        y2 = jnp.dot(slab2, w2p, preferred_element_type=f32) + b2            # (10, 70)
        p2 = relu_pool(y2, sel2, 10)                                         # (5, 35) [h, co*5+w]
        # ---- flatten: one (1, 175) row in (h, co, w) order; fc1 rows are permuted to
        #      match, so no per-feature masked scatter is needed ------------------------
        z_rows.append(jnp.concatenate([p2[h:h + 1, :] for h in range(5)], axis=-1))

    z = jnp.concatenate(z_rows, axis=0)                                      # (B, 175)

    # ---- fc1 + ReLU -> fc2, batched across the whole mini-batch ----------------------
    hid = jnp.maximum(
        jnp.dot(z, fc1_wp_ref[...], preferred_element_type=f32) + fc1_b_ref[...], 0.0)
    out = jnp.dot(hid, fc2_wp_ref[...], preferred_element_type=f32) + fc2_b_ref[...]
    o_ref[...] = out.astype(o_ref.dtype)                                     # lane-dense store


# ----------------------------------------------------------------------------
# One-time parameter packing (glue, runs outside the jitted hot path)
# ----------------------------------------------------------------------------

def pack_params(params):
    """Repack PyTorch-layout parameters once into the kernel's GEMM layouts."""
    K = 5
    w1 = np.asarray(params["conv1_w"], np.float32)    # (5, 1, 5, 5)
    b1 = np.asarray(params["conv1_b"], np.float32)    # (5,)
    w2 = np.asarray(params["conv2_w"], np.float32)    # (7, 5, 5, 5)
    b2 = np.asarray(params["conv2_b"], np.float32)    # (7,)
    fc1_w = np.asarray(params["fc1_w"], np.float32)   # (50, 175)
    fc1_b = np.asarray(params["fc1_b"], np.float32)   # (50,)
    fc2_w = np.asarray(params["fc2_w"], np.float32)   # (10, 50)
    fc2_b = np.asarray(params["fc2_b"], np.float32)   # (10,)

    # conv1: fold (ki, input width) into a 160-wide contraction; out-channels on lanes.
    #   w1p[ki*32 + (j+kj), co*28 + j] = w1[co, 0, ki, kj]
    w1p = np.zeros((K * 32, 5 * 28), np.float32)
    for co in range(5):
        for ki in range(K):
            for j in range(28):
                for kj in range(K):
                    w1p[ki * 32 + j + kj, co * 28 + j] = w1[co, 0, ki, kj]
    b1row = np.repeat(b1, 28)[None, :]                # (1, 140)

    # conv2: fold (ki, in-channel, width) into a 350-wide contraction.
    #   w2p[ki*70 + ci*14 + (j+kj), co*10 + j] = w2[co, ci, ki, kj]
    w2p = np.zeros((K * 5 * 14, 7 * 10), np.float32)
    for co in range(7):
        for ci in range(5):
            for ki in range(K):
                for j in range(10):
                    for kj in range(K):
                        w2p[ki * 70 + ci * 14 + j + kj, co * 10 + j] = w2[co, ci, ki, kj]
    b2row = np.repeat(b2, 10)[None, :]                # (1, 70)

    # Block-diagonal even-lane 2x1 pool selectors (exact 0/1 picks).
    sel1 = np.zeros((5 * 28 - 1, 5 * 14), np.float32)
    for co in range(5):
        for jp in range(14):
            sel1[co * 28 + 2 * jp, co * 14 + jp] = 1.0
    sel2 = np.zeros((7 * 10 - 1, 7 * 5), np.float32)
    for co in range(7):
        for jp in range(5):
            sel2[co * 10 + 2 * jp, co * 5 + jp] = 1.0

    # fc1: absorb the flatten permutation (PyTorch (co,h,w) order -> kernel (h,co,w) order).
    perm = np.zeros(175, np.int32)
    for h in range(5):
        for co in range(7):
            for w in range(5):
                perm[h * 35 + co * 5 + w] = co * 25 + h * 5 + w
    fc1_wp = fc1_w.T[perm, :]                         # (175, 50)

    # fc2: transpose + zero-pad to 128 output lanes (unmasked final store).
    fc2_wp = np.zeros((50, 128), np.float32)
    fc2_wp[:, :10] = fc2_w.T
    fc2_bp = np.zeros((1, 128), np.float32)
    fc2_bp[0, :10] = fc2_b

    packed = dict(w1p=w1p, b1=b1row, w2p=w2p, b2=b2row, sel1=sel1, sel2=sel2,
                  fc1_wp=fc1_wp, fc1_b=fc1_b[None, :], fc2_wp=fc2_wp, fc2_b=fc2_bp)
    return {k: jnp.asarray(v) for k, v in packed.items()}


# ----------------------------------------------------------------------------
# Forward wrapper: one pallas_call, no grid, everything VMEM-resident
# ----------------------------------------------------------------------------

def net_forward(packed, x):
    bsz = x.shape[0]
    assert x.shape[1:] == (1, 32, 32), "fc1(175) pins the input to (B, 1, 32, 32)"
    xs = x.astype(jnp.float32).reshape(bsz, 32, 32)    # x.float(), squeeze C=1
    vmem = pl.BlockSpec(memory_space=pltpu.MemorySpace.VMEM)
    out_padded = pl.pallas_call(
        _net_kernel,
        out_shape=jax.ShapeDtypeStruct((bsz, 128), jnp.float32),
        in_specs=[vmem] * 11,
        out_specs=vmem,
    )(xs, packed["w1p"], packed["b1"], packed["w2p"], packed["b2"],
      packed["sel1"], packed["sel2"],
      packed["fc1_wp"], packed["fc1_b"], packed["fc2_wp"], packed["fc2_b"])
    return out_padded[:, :10]                           # drop the lane padding


# ----------------------------------------------------------------------------
# Pure-JAX reference (silent correctness check)
# ----------------------------------------------------------------------------

def net_reference(params, x):
    x = x.astype(jnp.float32)

    def conv(v, w, b):
        y = lax.conv_general_dilated(
            v, w, (1, 1), "VALID", dimension_numbers=("NCHW", "OIHW", "NCHW"))
        return y + b.reshape(1, -1, 1, 1)

    def pool(v):
        return lax.reduce_window(v, -jnp.inf, lax.max,
                                 (1, 1, 2, 2), (1, 1, 2, 2), "VALID")

    h = pool(jax.nn.relu(conv(x, params["conv1_w"], params["conv1_b"])))
    h = pool(jax.nn.relu(conv(h, params["conv2_w"], params["conv2_b"])))
    h = h.reshape(h.shape[0], -1)
    h = jax.nn.relu(h @ params["fc1_w"].T + params["fc1_b"])
    return h @ params["fc2_w"].T + params["fc2_b"]


if __name__ == "__main__":
    key = jax.random.PRNGKey(0)
    ks = jax.random.split(key, 9)
    params = {
        "conv1_w": 0.1 * jax.random.normal(ks[0], (5, 1, 5, 5), jnp.float32),
        "conv1_b": 0.1 * jax.random.normal(ks[1], (5,), jnp.float32),
        "conv2_w": 0.1 * jax.random.normal(ks[2], (7, 5, 5, 5), jnp.float32),
        "conv2_b": 0.1 * jax.random.normal(ks[3], (7,), jnp.float32),
        "fc1_w": 0.1 * jax.random.normal(ks[4], (50, 175), jnp.float32),
        "fc1_b": 0.1 * jax.random.normal(ks[5], (50,), jnp.float32),
        "fc2_w": 0.1 * jax.random.normal(ks[6], (10, 50), jnp.float32),
        "fc2_b": 0.1 * jax.random.normal(ks[7], (10,), jnp.float32),
    }
    # (B, C, H, W) = (2, 1, 32, 32): 32x32 input is forced by fc1's 175 = 7*5*5 features.
    x = jax.random.normal(ks[8], (2, 1, 32, 32), jnp.float32)

    packed = pack_params(params)          # one-time parameter repacking (outside jit)
    fwd = jax.jit(net_forward)
    out = jax.block_until_ready(fwd(packed, x))
    assert out.shape == (2, 10) and out.dtype == jnp.float32

    ref = net_reference(params, x)
    # f32 everywhere in-kernel; tolerance covers MXU vs XLA summation-order differences.
    assert jnp.allclose(out, ref, atol=2e-3, rtol=2e-3), (out, ref)
    print("KERNEL_OK")
</pallas_src>

<mosaic_0001>
module attributes {stable_mosaic.version = 11 : i64} {
  func.func @_net_kernel(%arg0: memref<2x32x32xf32, #tpu.memory_space<vmem>>, %arg1: memref<160x140xf32, #tpu.memory_space<vmem>>, %arg2: memref<1x140xf32, #tpu.memory_space<vmem>>, %arg3: memref<350x70xf32, #tpu.memory_space<vmem>>, %arg4: memref<1x70xf32, #tpu.memory_space<vmem>>, %arg5: memref<139x70xf32, #tpu.memory_space<vmem>>, %arg6: memref<69x35xf32, #tpu.memory_space<vmem>>, %arg7: memref<175x50xf32, #tpu.memory_space<vmem>>, %arg8: memref<1x50xf32, #tpu.memory_space<vmem>>, %arg9: memref<50x128xf32, #tpu.memory_space<vmem>>, %arg10: memref<1x128xf32, #tpu.memory_space<vmem>>, %arg11: memref<2x128xf32, #tpu.memory_space<vmem>>) attributes {dimension_semantics = [], scalar_prefetch = 0 : i64, scratch_operands = 0 : i64, tpu.core_type = #tpu.core_type<tc>} {
    %c0 = arith.constant 0 : index
    %c0_0 = arith.constant 0 : index
    %0 = vector.load %arg1[%c0, %c0_0] : memref<160x140xf32, #tpu.memory_space<vmem>>, vector<160x140xf32>
    %c0_1 = arith.constant 0 : index
    %c0_2 = arith.constant 0 : index
    %1 = vector.load %arg2[%c0_1, %c0_2] : memref<1x140xf32, #tpu.memory_space<vmem>>, vector<1x140xf32>
    %c0_3 = arith.constant 0 : index
    %c0_4 = arith.constant 0 : index
    %2 = vector.load %arg3[%c0_3, %c0_4] : memref<350x70xf32, #tpu.memory_space<vmem>>, vector<350x70xf32>
    %c0_5 = arith.constant 0 : index
    %c0_6 = arith.constant 0 : index
    %3 = vector.load %arg4[%c0_5, %c0_6] : memref<1x70xf32, #tpu.memory_space<vmem>>, vector<1x70xf32>
    %c0_7 = arith.constant 0 : index
    %c0_8 = arith.constant 0 : index
    %4 = vector.load %arg5[%c0_7, %c0_8] : memref<139x70xf32, #tpu.memory_space<vmem>>, vector<139x70xf32>
    %c0_9 = arith.constant 0 : index
    %c0_10 = arith.constant 0 : index
    %5 = vector.load %arg6[%c0_9, %c0_10] : memref<69x35xf32, #tpu.memory_space<vmem>>, vector<69x35xf32>
    %c0_11 = arith.constant 0 : index
    %c0_12 = arith.constant 0 : index
    %c0_13 = arith.constant 0 : index
    %6 = vector.load %arg0[%c0_11, %c0_12, %c0_13] : memref<2x32x32xf32, #tpu.memory_space<vmem>>, vector<1x28x32xf32>
    %7 = vector.shape_cast %6 : vector<1x28x32xf32> to vector<28x32xf32>
    %c0_14 = arith.constant 0 : index
    %c1 = arith.constant 1 : index
    %c0_15 = arith.constant 0 : index
    %8 = vector.load %arg0[%c0_14, %c1, %c0_15] : memref<2x32x32xf32, #tpu.memory_space<vmem>>, vector<1x28x32xf32>
    %9 = vector.shape_cast %8 : vector<1x28x32xf32> to vector<28x32xf32>
    %c0_16 = arith.constant 0 : index
    %c2 = arith.constant 2 : index
    %c0_17 = arith.constant 0 : index
    %10 = vector.load %arg0[%c0_16, %c2, %c0_17] : memref<2x32x32xf32, #tpu.memory_space<vmem>>, vector<1x28x32xf32>
    %11 = vector.shape_cast %10 : vector<1x28x32xf32> to vector<28x32xf32>
    %c0_18 = arith.constant 0 : index
    %c3 = arith.constant 3 : index
    %c0_19 = arith.constant 0 : index
    %12 = vector.load %arg0[%c0_18, %c3, %c0_19] : memref<2x32x32xf32, #tpu.memory_space<vmem>>, vector<1x28x32xf32>
    %13 = vector.shape_cast %12 : vector<1x28x32xf32> to vector<28x32xf32>
    %c0_20 = arith.constant 0 : index
    %c4 = arith.constant 4 : index
    %c0_21 = arith.constant 0 : index
    %14 = vector.load %arg0[%c0_20, %c4, %c0_21] : memref<2x32x32xf32, #tpu.memory_space<vmem>>, vector<1x28x32xf32>
    %15 = vector.shape_cast %14 : vector<1x28x32xf32> to vector<28x32xf32>
    %16 = tpu.concatenate %7, %9, %11, %13, %15 in 1 : vector<28x32xf32>, vector<28x32xf32>, vector<28x32xf32>, vector<28x32xf32>, vector<28x32xf32> -> vector<28x160xf32>
    %cst = arith.constant dense<0.000000e+00> : vector<28x140xf32>
    %17 = tpu.matmul %16, %0, %cst {dimension_numbers = #tpu.dot_dimension_numbers<[1], [0], [0], [1], [0, 0, 1, 1], [], []>} : vector<28x160xf32>, vector<160x140xf32>, vector<28x140xf32> -> vector<28x140xf32>
    %18 = vector.broadcast %1 : vector<1x140xf32> to vector<28x140xf32>
    %19 = arith.addf %17, %18 : vector<28x140xf32>
    %cst_22 = arith.constant 0.000000e+00 : f32
    %20 = vector.broadcast %cst_22 : f32 to vector<28x140xf32>
    %21 = arith.maximumf %19, %20 : vector<28x140xf32>
    %22 = vector.extract_strided_slice %21 {offsets = [0, 0], sizes = [28, 139], strides = [1, 1]} : vector<28x140xf32> to vector<28x139xf32>
    %23 = vector.extract_strided_slice %21 {offsets = [0, 1], sizes = [28, 139], strides = [1, 1]} : vector<28x140xf32> to vector<28x139xf32>
    %24 = arith.maximumf %22, %23 : vector<28x139xf32>
    %cst_23 = arith.constant dense<0.000000e+00> : vector<28x70xf32>
    %25 = tpu.matmul %24, %4, %cst_23 {dimension_numbers = #tpu.dot_dimension_numbers<[1], [0], [0], [1], [0, 0, 1, 1], [], []>} : vector<28x139xf32>, vector<139x70xf32>, vector<28x70xf32> -> vector<28x70xf32>
    %26 = vector.shape_cast %25 : vector<28x70xf32> to vector<14x2x70xf32>
    %27 = vector.extract_strided_slice %26 {offsets = [0, 0, 0], sizes = [14, 1, 70], strides = [1, 1, 1]} : vector<14x2x70xf32> to vector<14x1x70xf32>
    %28 = vector.shape_cast %27 : vector<14x1x70xf32> to vector<14x70xf32>
    %29 = vector.extract_strided_slice %26 {offsets = [0, 1, 0], sizes = [14, 1, 70], strides = [1, 1, 1]} : vector<14x2x70xf32> to vector<14x1x70xf32>
    %30 = vector.shape_cast %29 : vector<14x1x70xf32> to vector<14x70xf32>
    %31 = arith.maximumf %28, %30 : vector<14x70xf32>
    %32 = vector.extract_strided_slice %31 {offsets = [0, 0], sizes = [10, 70], strides = [1, 1]} : vector<14x70xf32> to vector<10x70xf32>
    %33 = vector.extract_strided_slice %31 {offsets = [1, 0], sizes = [10, 70], strides = [1, 1]} : vector<14x70xf32> to vector<10x70xf32>
    %34 = vector.extract_strided_slice %31 {offsets = [2, 0], sizes = [10, 70], strides = [1, 1]} : vector<14x70xf32> to vector<10x70xf32>
    %35 = vector.extract_strided_slice %31 {offsets = [3, 0], sizes = [10, 70], strides = [1, 1]} : vector<14x70xf32> to vector<10x70xf32>
    %36 = vector.extract_strided_slice %31 {offsets = [4, 0], sizes = [10, 70], strides = [1, 1]} : vector<14x70xf32> to vector<10x70xf32>
    %37 = tpu.concatenate %32, %33, %34, %35, %36 in 1 : vector<10x70xf32>, vector<10x70xf32>, vector<10x70xf32>, vector<10x70xf32>, vector<10x70xf32> -> vector<10x350xf32>
    %cst_24 = arith.constant dense<0.000000e+00> : vector<10x70xf32>
    %38 = tpu.matmul %37, %2, %cst_24 {dimension_numbers = #tpu.dot_dimension_numbers<[1], [0], [0], [1], [0, 0, 1, 1], [], []>} : vector<10x350xf32>, vector<350x70xf32>, vector<10x70xf32> -> vector<10x70xf32>
    %39 = vector.broadcast %3 : vector<1x70xf32> to vector<10x70xf32>
    %40 = arith.addf %38, %39 : vector<10x70xf32>
    %cst_25 = arith.constant 0.000000e+00 : f32
    %41 = vector.broadcast %cst_25 : f32 to vector<10x70xf32>
    %42 = arith.maximumf %40, %41 : vector<10x70xf32>
    %43 = vector.extract_strided_slice %42 {offsets = [0, 0], sizes = [10, 69], strides = [1, 1]} : vector<10x70xf32> to vector<10x69xf32>
    %44 = vector.extract_strided_slice %42 {offsets = [0, 1], sizes = [10, 69], strides = [1, 1]} : vector<10x70xf32> to vector<10x69xf32>
    %45 = arith.maximumf %43, %44 : vector<10x69xf32>
    %cst_26 = arith.constant dense<0.000000e+00> : vector<10x35xf32>
    %46 = tpu.matmul %45, %5, %cst_26 {dimension_numbers = #tpu.dot_dimension_numbers<[1], [0], [0], [1], [0, 0, 1, 1], [], []>} : vector<10x69xf32>, vector<69x35xf32>, vector<10x35xf32> -> vector<10x35xf32>
    %47 = vector.shape_cast %46 : vector<10x35xf32> to vector<5x2x35xf32>
    %48 = vector.extract_strided_slice %47 {offsets = [0, 0, 0], sizes = [5, 1, 35], strides = [1, 1, 1]} : vector<5x2x35xf32> to vector<5x1x35xf32>
    %49 = vector.shape_cast %48 : vector<5x1x35xf32> to vector<5x35xf32>
    %50 = vector.extract_strided_slice %47 {offsets = [0, 1, 0], sizes = [5, 1, 35], strides = [1, 1, 1]} : vector<5x2x35xf32> to vector<5x1x35xf32>
    %51 = vector.shape_cast %50 : vector<5x1x35xf32> to vector<5x35xf32>
    %52 = arith.maximumf %49, %51 : vector<5x35xf32>
    %53 = vector.extract_strided_slice %52 {offsets = [0, 0], sizes = [1, 35], strides = [1, 1]} : vector<5x35xf32> to vector<1x35xf32>
    %54 = vector.extract_strided_slice %52 {offsets = [1, 0], sizes = [1, 35], strides = [1, 1]} : vector<5x35xf32> to vector<1x35xf32>
    %55 = vector.extract_strided_slice %52 {offsets = [2, 0], sizes = [1, 35], strides = [1, 1]} : vector<5x35xf32> to vector<1x35xf32>
    %56 = vector.extract_strided_slice %52 {offsets = [3, 0], sizes = [1, 35], strides = [1, 1]} : vector<5x35xf32> to vector<1x35xf32>
    %57 = vector.extract_strided_slice %52 {offsets = [4, 0], sizes = [1, 35], strides = [1, 1]} : vector<5x35xf32> to vector<1x35xf32>
    %58 = tpu.concatenate %53, %54, %55, %56, %57 in 1 : vector<1x35xf32>, vector<1x35xf32>, vector<1x35xf32>, vector<1x35xf32>, vector<1x35xf32> -> vector<1x175xf32>
    %c1_27 = arith.constant 1 : index
    %c0_28 = arith.constant 0 : index
    %c0_29 = arith.constant 0 : index
    %59 = vector.load %arg0[%c1_27, %c0_28, %c0_29] : memref<2x32x32xf32, #tpu.memory_space<vmem>>, vector<1x28x32xf32>
    %60 = vector.shape_cast %59 : vector<1x28x32xf32> to vector<28x32xf32>
    %c1_30 = arith.constant 1 : index
    %c1_31 = arith.constant 1 : index
    %c0_32 = arith.constant 0 : index
    %61 = vector.load %arg0[%c1_30, %c1_31, %c0_32] : memref<2x32x32xf32, #tpu.memory_space<vmem>>, vector<1x28x32xf32>
    %62 = vector.shape_cast %61 : vector<1x28x32xf32> to vector<28x32xf32>
    %c1_33 = arith.constant 1 : index
    %c2_34 = arith.constant 2 : index
    %c0_35 = arith.constant 0 : index
    %63 = vector.load %arg0[%c1_33, %c2_34, %c0_35] : memref<2x32x32xf32, #tpu.memory_space<vmem>>, vector<1x28x32xf32>
    %64 = vector.shape_cast %63 : vector<1x28x32xf32> to vector<28x32xf32>
    %c1_36 = arith.constant 1 : index
    %c3_37 = arith.constant 3 : index
    %c0_38 = arith.constant 0 : index
    %65 = vector.load %arg0[%c1_36, %c3_37, %c0_38] : memref<2x32x32xf32, #tpu.memory_space<vmem>>, vector<1x28x32xf32>
    %66 = vector.shape_cast %65 : vector<1x28x32xf32> to vector<28x32xf32>
    %c1_39 = arith.constant 1 : index
    %c4_40 = arith.constant 4 : index
    %c0_41 = arith.constant 0 : index
    %67 = vector.load %arg0[%c1_39, %c4_40, %c0_41] : memref<2x32x32xf32, #tpu.memory_space<vmem>>, vector<1x28x32xf32>
    %68 = vector.shape_cast %67 : vector<1x28x32xf32> to vector<28x32xf32>
    %69 = tpu.concatenate %60, %62, %64, %66, %68 in 1 : vector<28x32xf32>, vector<28x32xf32>, vector<28x32xf32>, vector<28x32xf32>, vector<28x32xf32> -> vector<28x160xf32>
    %cst_42 = arith.constant dense<0.000000e+00> : vector<28x140xf32>
    %70 = tpu.matmul %69, %0, %cst_42 {dimension_numbers = #tpu.dot_dimension_numbers<[1], [0], [0], [1], [0, 0, 1, 1], [], []>} : vector<28x160xf32>, vector<160x140xf32>, vector<28x140xf32> -> vector<28x140xf32>
    %71 = vector.broadcast %1 : vector<1x140xf32> to vector<28x140xf32>
    %72 = arith.addf %70, %71 : vector<28x140xf32>
    %cst_43 = arith.constant 0.000000e+00 : f32
    %73 = vector.broadcast %cst_43 : f32 to vector<28x140xf32>
    %74 = arith.maximumf %72, %73 : vector<28x140xf32>
    %75 = vector.extract_strided_slice %74 {offsets = [0, 0], sizes = [28, 139], strides = [1, 1]} : vector<28x140xf32> to vector<28x139xf32>
    %76 = vector.extract_strided_slice %74 {offsets = [0, 1], sizes = [28, 139], strides = [1, 1]} : vector<28x140xf32> to vector<28x139xf32>
    %77 = arith.maximumf %75, %76 : vector<28x139xf32>
    %cst_44 = arith.constant dense<0.000000e+00> : vector<28x70xf32>
    %78 = tpu.matmul %77, %4, %cst_44 {dimension_numbers = #tpu.dot_dimension_numbers<[1], [0], [0], [1], [0, 0, 1, 1], [], []>} : vector<28x139xf32>, vector<139x70xf32>, vector<28x70xf32> -> vector<28x70xf32>
    %79 = vector.shape_cast %78 : vector<28x70xf32> to vector<14x2x70xf32>
    %80 = vector.extract_strided_slice %79 {offsets = [0, 0, 0], sizes = [14, 1, 70], strides = [1, 1, 1]} : vector<14x2x70xf32> to vector<14x1x70xf32>
    %81 = vector.shape_cast %80 : vector<14x1x70xf32> to vector<14x70xf32>
    %82 = vector.extract_strided_slice %79 {offsets = [0, 1, 0], sizes = [14, 1, 70], strides = [1, 1, 1]} : vector<14x2x70xf32> to vector<14x1x70xf32>
    %83 = vector.shape_cast %82 : vector<14x1x70xf32> to vector<14x70xf32>
    %84 = arith.maximumf %81, %83 : vector<14x70xf32>
    %85 = vector.extract_strided_slice %84 {offsets = [0, 0], sizes = [10, 70], strides = [1, 1]} : vector<14x70xf32> to vector<10x70xf32>
    %86 = vector.extract_strided_slice %84 {offsets = [1, 0], sizes = [10, 70], strides = [1, 1]} : vector<14x70xf32> to vector<10x70xf32>
    %87 = vector.extract_strided_slice %84 {offsets = [2, 0], sizes = [10, 70], strides = [1, 1]} : vector<14x70xf32> to vector<10x70xf32>
    %88 = vector.extract_strided_slice %84 {offsets = [3, 0], sizes = [10, 70], strides = [1, 1]} : vector<14x70xf32> to vector<10x70xf32>
    %89 = vector.extract_strided_slice %84 {offsets = [4, 0], sizes = [10, 70], strides = [1, 1]} : vector<14x70xf32> to vector<10x70xf32>
    %90 = tpu.concatenate %85, %86, %87, %88, %89 in 1 : vector<10x70xf32>, vector<10x70xf32>, vector<10x70xf32>, vector<10x70xf32>, vector<10x70xf32> -> vector<10x350xf32>
    %cst_45 = arith.constant dense<0.000000e+00> : vector<10x70xf32>
    %91 = tpu.matmul %90, %2, %cst_45 {dimension_numbers = #tpu.dot_dimension_numbers<[1], [0], [0], [1], [0, 0, 1, 1], [], []>} : vector<10x350xf32>, vector<350x70xf32>, vector<10x70xf32> -> vector<10x70xf32>
    %92 = vector.broadcast %3 : vector<1x70xf32> to vector<10x70xf32>
    %93 = arith.addf %91, %92 : vector<10x70xf32>
    %cst_46 = arith.constant 0.000000e+00 : f32
    %94 = vector.broadcast %cst_46 : f32 to vector<10x70xf32>
    %95 = arith.maximumf %93, %94 : vector<10x70xf32>
    %96 = vector.extract_strided_slice %95 {offsets = [0, 0], sizes = [10, 69], strides = [1, 1]} : vector<10x70xf32> to vector<10x69xf32>
    %97 = vector.extract_strided_slice %95 {offsets = [0, 1], sizes = [10, 69], strides = [1, 1]} : vector<10x70xf32> to vector<10x69xf32>
    %98 = arith.maximumf %96, %97 : vector<10x69xf32>
    %cst_47 = arith.constant dense<0.000000e+00> : vector<10x35xf32>
    %99 = tpu.matmul %98, %5, %cst_47 {dimension_numbers = #tpu.dot_dimension_numbers<[1], [0], [0], [1], [0, 0, 1, 1], [], []>} : vector<10x69xf32>, vector<69x35xf32>, vector<10x35xf32> -> vector<10x35xf32>
    %100 = vector.shape_cast %99 : vector<10x35xf32> to vector<5x2x35xf32>
    %101 = vector.extract_strided_slice %100 {offsets = [0, 0, 0], sizes = [5, 1, 35], strides = [1, 1, 1]} : vector<5x2x35xf32> to vector<5x1x35xf32>
    %102 = vector.shape_cast %101 : vector<5x1x35xf32> to vector<5x35xf32>
    %103 = vector.extract_strided_slice %100 {offsets = [0, 1, 0], sizes = [5, 1, 35], strides = [1, 1, 1]} : vector<5x2x35xf32> to vector<5x1x35xf32>
    %104 = vector.shape_cast %103 : vector<5x1x35xf32> to vector<5x35xf32>
    %105 = arith.maximumf %102, %104 : vector<5x35xf32>
    %106 = vector.extract_strided_slice %105 {offsets = [0, 0], sizes = [1, 35], strides = [1, 1]} : vector<5x35xf32> to vector<1x35xf32>
    %107 = vector.extract_strided_slice %105 {offsets = [1, 0], sizes = [1, 35], strides = [1, 1]} : vector<5x35xf32> to vector<1x35xf32>
    %108 = vector.extract_strided_slice %105 {offsets = [2, 0], sizes = [1, 35], strides = [1, 1]} : vector<5x35xf32> to vector<1x35xf32>
    %109 = vector.extract_strided_slice %105 {offsets = [3, 0], sizes = [1, 35], strides = [1, 1]} : vector<5x35xf32> to vector<1x35xf32>
    %110 = vector.extract_strided_slice %105 {offsets = [4, 0], sizes = [1, 35], strides = [1, 1]} : vector<5x35xf32> to vector<1x35xf32>
    %111 = tpu.concatenate %106, %107, %108, %109, %110 in 1 : vector<1x35xf32>, vector<1x35xf32>, vector<1x35xf32>, vector<1x35xf32>, vector<1x35xf32> -> vector<1x175xf32>
    %112 = tpu.concatenate %58, %111 in 0 : vector<1x175xf32>, vector<1x175xf32> -> vector<2x175xf32>
    %c0_48 = arith.constant 0 : index
    %c0_49 = arith.constant 0 : index
    %113 = vector.load %arg7[%c0_48, %c0_49] : memref<175x50xf32, #tpu.memory_space<vmem>>, vector<175x50xf32>
    %cst_50 = arith.constant dense<0.000000e+00> : vector<2x50xf32>
    %114 = tpu.matmul %112, %113, %cst_50 {dimension_numbers = #tpu.dot_dimension_numbers<[1], [0], [0], [1], [0, 0, 1, 1], [], []>} : vector<2x175xf32>, vector<175x50xf32>, vector<2x50xf32> -> vector<2x50xf32>
    %c0_51 = arith.constant 0 : index
    %c0_52 = arith.constant 0 : index
    %115 = vector.load %arg8[%c0_51, %c0_52] : memref<1x50xf32, #tpu.memory_space<vmem>>, vector<1x50xf32>
    %116 = vector.broadcast %115 : vector<1x50xf32> to vector<2x50xf32>
    %117 = arith.addf %114, %116 : vector<2x50xf32>
    %cst_53 = arith.constant 0.000000e+00 : f32
    %118 = vector.broadcast %cst_53 : f32 to vector<2x50xf32>
    %119 = arith.maximumf %117, %118 : vector<2x50xf32>
    %c0_54 = arith.constant 0 : index
    %c0_55 = arith.constant 0 : index
    %120 = vector.load %arg9[%c0_54, %c0_55] : memref<50x128xf32, #tpu.memory_space<vmem>>, vector<50x128xf32>
    %cst_56 = arith.constant dense<0.000000e+00> : vector<2x128xf32>
    %121 = tpu.matmul %119, %120, %cst_56 {dimension_numbers = #tpu.dot_dimension_numbers<[1], [0], [0], [1], [0, 0, 1, 1], [], []>} : vector<2x50xf32>, vector<50x128xf32>, vector<2x128xf32> -> vector<2x128xf32>
    %c0_57 = arith.constant 0 : index
    %c0_58 = arith.constant 0 : index
    %122 = vector.load %arg10[%c0_57, %c0_58] : memref<1x128xf32, #tpu.memory_space<vmem>>, vector<1x128xf32>
    %123 = vector.broadcast %122 : vector<1x128xf32> to vector<2x128xf32>
    %124 = arith.addf %121, %123 : vector<2x128xf32>
    %c0_59 = arith.constant 0 : index
    %c0_60 = arith.constant 0 : index
    %125 = vector.load %arg11[%c0_59, %c0_60] : memref<2x128xf32, #tpu.memory_space<vmem>>, vector<2x128xf32>
    tpu.vector_store %arg11[%c0_59, %c0_60], %124 {strides = array<i32>} : memref<2x128xf32, #tpu.memory_space<vmem>>, vector<2x128xf32>,
    return
  }
}

</mosaic_0001>

<bundles_post_ra>
// kernel: net_forward.1
= control target key start
LH: loop header
LB: loop body
LE: loop exit
PB: predicated region body
PF: predicated region fallthrough
CT: control target
= control target key end

     0   :  { %s3061_s23 = smov 96   ;;  %s3062_s30 = smov 32   ;;  %vm220_vm0 = vcmask 261120   ;;  %s4405_s0 = inlined_call_operand.vmem [shape: f32[2,32,32], index: 0, kind: input, shape index: {}]   ;;  %s4406_s1 = inlined_call_operand.vmem [shape: f32[160,140], index: 1, kind: input, shape index: {}]   ;;  %s4407_s2 = inlined_call_operand.vmem [shape: f32[1,140], index: 2, kind: input, shape index: {}]   ;;  %s4408_s3 = inlined_call_operand.vmem [shape: f32[350,70], index: 3, kind: input, shape index: {}]   ;;  %s4409_s4 = inlined_call_operand.vmem [shape: f32[1,70], index: 4, kind: input, shape index: {}]   ;;  %s4410_s5 = inlined_call_operand.vmem [shape: f32[139,70], index: 5, kind: input, shape index: {}]   ;;  %s4411_s6 = inlined_call_operand.vmem [shape: f32[69,35], index: 6, kind: input, shape index: {}]   ;;  %s4412_s7 = inlined_call_operand.vmem [shape: f32[175,50], index: 7, kind: input, shape index: {}]   ;;  %s4413_s8 = inlined_call_operand.vmem [shape: f32[1,50], index: 8, kind: input, shape index: {}]   ;;  %s4414_s9 = inlined_call_operand.vmem [shape: f32[50,128], index: 9, kind: input, shape index: {}]   ;;  %s4415_s10 = inlined_call_operand.vmem [shape: f32[1,128], index: 10, kind: input, shape index: {}]   ;;  %s4416_s11 = inlined_call_operand.hbm [shape: f32[2,128], index: 11, kind: output, shape index: {}]  }
   0x1   :  { %v156_v0 = vld [vmem:[%s4405_s0 + $0x1] sm:$0xff]  ;;  %v157_v1 = vld [vmem:[%s4405_s0 + $0x9] sm:$0xff]  ;;  %v162_v8 = vld [vmem:[%s4405_s0 + $0x12] sm:$0xff]  ;;  %s3063_s15 = smov 64  }
   0x2   :  { %v164_v2 = vld [vmem:[%s4405_s0 + $0x3] sm:$0xff]  ;;  %v2997_v3 = vpack.i.bf16 %v157_v1, %v156_v0  ;;  %v165_v6 = vld [vmem:[%s4405_s0 + $0xb] sm:$0xff]  ;;  %v42_v10 = vld [vmem:[%s4406_s1 + $0x18] sm:$0xff] }
   0x3   :  { %208 = vrot.lane.b32.xlu1 %v164_v2, %s3061_s23  ;;  %v160_v4 = vld [vmem:[%s4405_s0 + $0x2] sm:$0xff]  ;;  %v161_v5 = vld [vmem:[%s4405_s0 + $0xa] sm:$0xff]  ;;  %v46_v15 = vld [vmem:[%s4406_s1 + $0x38] sm:$0xff] }
   0x4   :  { %2998 = vrot.lane.b32.xlu0 %v2997_v3, %s3062_s30  ;;  %v3002_v7 = vpack.i.bf16 %v161_v5, %v160_v4  ;;  %v40_v9 = vld [vmem:[%s4406_s1 + $0x8] sm:$0xff]  ;;  %v39_v11 = vld [vmem:[%s4406_s1] sm:$0xff]  ;;  %v41_v13 = vld [vmem:[%s4406_s1 + $0x10] sm:$0xff] }
   0x5   :  { %v3170_v12 = vpack.c.bf16 %v42_v10, %v40_v9  ;;  %v44_v14 = vld [vmem:[%s4406_s1 + $0x28] sm:$0xff]  ;;  %v3181_v16 = vpack.c.bf16 %v41_v13, %v39_v11  ;;  %v43_v18 = vld [vmem:[%s4406_s1 + $0x20] sm:$0xff]  ;;  %v45_v19 = vld [vmem:[%s4406_s1 + $0x30] sm:$0xff] }
   0x6   :  { %v3183_v17 = vpack.c.bf16 %v46_v15, %v44_v14  ;;  %v48_v20 = vld [vmem:[%s4406_s1 + $0x48] sm:$0xff]  ;;  %v50_v21 = vld [vmem:[%s4406_s1 + $0x58] sm:$0xff]  ;;  %v3203_v23 = vpack.c.bf16 %v45_v19, %v43_v18  ;;  %v47_v25 = vld [vmem:[%s4406_s1 + $0x40] sm:$0xff] }
   0x7   :  { %210 = vrot.lane.b32.xlu1 %v165_v6, %s3061_s23  ;;  %2655 = vmatprep.subr.bf16.mxu0 %v3170_v12  ;;  %v158_v22 = vld [vmem:[%s4405_s0 + $0x11] sm:$0xff]  ;;  %v3207_v24 = vpack.c.bf16 %v50_v21, %v48_v20  ;;  %v159_v27 = vld [vmem:[%s4405_s0 + $0x19] sm:$0xf]  ;;  %v52_v28 = vld [vmem:[%s4406_s1 + $0x68] sm:$0xff] }
   0x8   :  { %3003 = vrot.lane.b32.xlu0 %v3002_v7, %s3063_s15  ;;  %2657 = vmatpush1.bf16.msra.mxu0 %v3181_v16  ;;  %v49_v26 = vld [vmem:[%s4406_s1 + $0x50] sm:$0xff]  ;;  %v54_v29 = vld [vmem:[%s4406_s1 + $0x78] sm:$0xff]  ;;  %v51_v33 = vld [vmem:[%s4406_s1 + $0x60] sm:$0xff] }
   0x9   :  { %2659 = vmatprep.subr.bf16.mxu0 %v3183_v17  ;;  %v166_v30 = vld [vmem:[%s4405_s0 + $0x13] sm:$0xff]  ;;  %v3229_v31 = vpack.c.bf16 %v49_v26, %v47_v25  ;;  %v3233_v32 = vpack.c.bf16 %v54_v29, %v52_v28  ;;  %v167_v35 = vld [vmem:[%s4405_s0 + $0x1b] sm:$0xf]  ;;  %v56_v36 = vld [vmem:[%s4406_s1 + $0x88] sm:$0xff] }
   0xa   :  { %v53_v34 = vld [vmem:[%s4406_s1 + $0x70] sm:$0xff]  ;;  %v58_v37 = vld [vmem:[%s4406_s1 + $0x98] sm:$0xff]  ;;  %v55_v41 = vld [vmem:[%s4406_s1 + $0x80] sm:$0xff] }
   0xb   :  { %196 = vrot.lane.b32.xlu1 %v162_v8, %s3063_s15  ;;  %v163_v38 = vld [vmem:[%s4405_s0 + $0x1a] sm:$0xf]  ;;  %v3255_v39 = vpack.c.bf16 %v53_v34, %v51_v33  ;;  %v3259_v40 = vpack.c.bf16 %v58_v37, %v56_v36  ;;  %v57_v42 = vld [vmem:[%s4406_s1 + $0x90] sm:$0xff]  ;;  %v168_v43 = vld [vmem:[%s4405_s0 + $0x4] sm:$0xff] }
   0xc   :  { %180 = vrot.lane.b32.xlu0 %v158_v22, %s3062_s30  ;;  %2661 = vmatpush1.bf16.msra.mxu0 %v3203_v23  ;;  %v60_v44 = vld [vmem:[%s4406_s1 + $0xa8] sm:$0xff]  ;;  %v62_v45 = vld [vmem:[%s4406_s1 + $0xb8] sm:$0xff]  ;;  %v3279_v46 = vpack.c.bf16 %v57_v42, %v55_v41 }
   0xd   :  { %2663 = vmatprep.subr.bf16.mxu0 %v3207_v24  ;;  %2312 = vmatprep.mubr.msk.f32.mxu0 %vm220_vm0, %v168_v43 }
   0xf   :  { %182 = vrot.lane.b32.xlu1 %v159_v27, %s3062_s30 }
  0x10   :  { %212 = vrot.lane.b32.xlu0 %v166_v30, %s3061_s23  ;;  %2665 = vmatpush1.bf16.msra.mxu0 %v3229_v31 }
  0x11   :  { %2667 = vmatprep.subr.bf16.mxu0 %v3233_v32 }
  0x13   :  { %214 = vrot.lane.b32.xlu1 %v167_v35, %s3061_s23 }
  0x14   :  { %198 = vrot.lane.b32.xlu0 %v163_v38, %s3063_s15  ;;  %2669 = vmatpush1.bf16.msra.mxu0 %v3255_v39 }
  0x15   :  { %16 = vsyncpa [#allocation3], 0  ;;  %2671 = vmatprep.subr.bf16.mxu0 %v3259_v40  ;;  %v3282_v47 = vpack.c.bf16 %v62_v45, %v60_v44  ;;  %v59_v48 = vld [vmem:[%s4406_s1 + $0xa0] sm:$0xff]  ;;  %v61_v49 = vld [vmem:[%s4406_s1 + $0xb0] sm:$0xff]  ;;  %vm225_vm1 = vcmask 523264   ;;  %vm230_vm2 = vcmask 785408  }
  0x16   :  { %v64_v50 = vld [vmem:[%s4406_s1 + $0xc8] sm:$0xff]  ;;  %v66_v51 = vld [vmem:[%s4406_s1 + $0xd8] sm:$0xff]  ;;  %v3297_v52 = vpack.c.bf16 %v61_v49, %v59_v48  ;;  %v63_v54 = vld [vmem:[%s4406_s1 + $0xc0] sm:$0xff]  ;;  %vm413_vm3 = vcmask 1042432   ;;  %vm4443_vm4 = vmmov 1   ;;  %vm379_vm6 = vcmask 1039360  }
  0x17   :  { %v3300_v53 = vpack.c.bf16 %v66_v51, %v64_v50  ;;  %v65_v55 = vld [vmem:[%s4406_s1 + $0xd0] sm:$0xff]  ;;  %v68_v56 = vld [vmem:[%s4406_s1 + $0xe8] sm:$0xff]  ;;  %v70_v57 = vld [vmem:[%s4406_s1 + $0xf8] sm:$0xff]  ;;  %vm400_vm7 = vcmask 89088   ;;  %vm685_vm8 = vcmask 1041409   ;;  %vm687_vm9 = vcmask 1042434  }
  0x18   :  { %2673 = vmatpush1.bf16.msra.mxu0 %v3279_v46  ;;  %v3315_v58 = vpack.c.bf16 %v65_v55, %v63_v54  ;;  %v3318_v59 = vpack.c.bf16 %v70_v57, %v68_v56  ;;  %v67_v60 = vld [vmem:[%s4406_s1 + $0xe0] sm:$0xff]  ;;  %v69_v61 = vld [vmem:[%s4406_s1 + $0xf0] sm:$0xff]  ;;  %v72_v62 = vld [vmem:[%s4406_s1 + $0x108] sm:$0xff]  ;;  %vm689_vm10 = vcmask 1043459   ;;  %vm691_vm11 = vcmask 1044484   ;;  %s3069_s18 = smov 70  }
  0x19   :  { %2675 = vmatprep.subr.bf16.mxu0 %v3282_v47  ;;  %v74_v63 = vld [vmem:[%s4406_s1 + $0x118] sm:$0xff]  ;;  %v3333_v0 = vpack.c.bf16 %v69_v61, %v67_v60  ;;  %v71_v2 = vld [vmem:[%s4406_s1 + $0x100] sm:$0xff]  ;;  %v73_v3 = vld [vmem:[%s4406_s1 + $0x110] sm:$0xff]  ;;  %vm4446_vm12 = vcmask 1045509   ;;  %vm4445_vm13 = vcmask 1046534   ;;  %vm4444_vm14 = vcmask 1047559  }
  0x1a   :  { %v3336_v1 = vpack.c.bf16 %v74_v63, %v72_v62  ;;  %v76_v4 = vld [vmem:[%s4406_s1 + $0x128] sm:$0xff]  ;;  %v78_v5 = vld [vmem:[%s4406_s1 + $0x138] sm:$0xff]  ;;  %v3351_v6 = vpack.c.bf16 %v73_v3, %v71_v2  ;;  %v75_v8 = vld [vmem:[%s4406_s1 + $0x120] sm:$0xff]  ;;  %v4417_v62 = vmov 0.0|0.0   ;;  %s3070_s13 = smov 82   ;;  %vm803_vm15 = vcmask 1045504  }
  0x1b   :  { %v3354_v7 = vpack.c.bf16 %v78_v5, %v76_v4  ;;  %v77_v9 = vld [vmem:[%s4406_s1 + $0x130] sm:$0xff]  ;;  %v152_v18 = vld [vmem:[%s4405_s0] sm:$0xff]  ;;  %v153_v25 = vld [vmem:[%s4405_s0 + $0x8] sm:$0xff]  ;;  %2694 = vmatprep.subr.bf16.mxu1 %v4417_v62  ;;  %s3073_s19 = smov 105   ;;  %s3076_s25 = smov [#allocation2]  }
  0x1c   :  { %2677 = vmatpush1.bf16.msra.mxu0 %v3297_v52  ;;  %v3363_v10 = vpack.c.bf16 %v77_v9, %v75_v8  ;;  %v154_v28 = vld [vmem:[%s4405_s0 + $0x10] sm:$0xff]  ;;  %v155_v41 = vld [vmem:[%s4405_s0 + $0x18] sm:$0xf]  ;;  %v171_v50 = vld [vmem:[%s4405_s0 + $0x1c] sm:$0xf]  ;;  %s2304_s26 = sshll.u32 %s3076_s25, 4  ;;  %s2305_s26 = int_to_ptr.vmem [resolvable:$true] %s2304_s26 }
  0x1d   :  { %2679 = vmatprep.subr.bf16.mxu0 %v3300_v53  ;;  %v169_v30 = vld [vmem:[%s4405_s0 + $0xc] sm:$0xff]  ;;  %v170_v42 = vld [vmem:[%s4405_s0 + $0x14] sm:$0xff]  ;;  %v125_v57 = vld [vmem:[%s4410_s5] sm:$0xff]  ;;  %p3042_p1 = scmp.lt.s32.totalorder %s2305_s26, %s2305_s26 }
  0x1e   :  { %v126_v60 = vld [vmem:[%s4410_s5 + $0x8] sm:$0xff]  ;;  %v127_v61 = vld [vmem:[%s4410_s5 + $0x10] sm:$0xff]  ;;  %v128_v2 = vld [vmem:[%s4410_s5 + $0x18] sm:$0xff] }
  0x1f   :  { %v3413_v63 = vpack.c.bf16 %v126_v60, %v125_v57  ;;  %v3419_v3 = vpack.c.bf16 %v128_v2, %v127_v61  ;;  %v129_v4 = vld [vmem:[%s4410_s5 + $0x20] sm:$0xff]  ;;  %v130_v5 = vld [vmem:[%s4410_s5 + $0x28] sm:$0xff]  ;;  %v131_v9 = vld [vmem:[%s4410_s5 + $0x30] sm:$0xff] }
  0x20   :  { %2681 = vmatpush1.bf16.msra.mxu0 %v3315_v58  ;;  %v3429_v8 = vpack.c.bf16 %v130_v5, %v129_v4  ;;  %vm3495_vm5 = vmpackc.low %vm413_vm3, %vm4443_vm4 }
  0x21   :  { %2683 = vmatprep.subr.bf16.mxu0 %v3318_v59  ;;  %4448 = vst [vmem:[#allocation5_spill] sm:$0xff] %v3413_v63  ;;  %2696 = vmatpush1.bf16.msra.mxu1 %v3413_v63  ;;  %4449 = vst [vmem:[#allocation6_spill] sm:$0xff] %v3419_v3 }
  0x22   :  { %2697 = vmatprep.subr.bf16.mxu1 %v4417_v62  ;;  %4450 = vst [vmem:[#allocation7_spill] sm:$0xff] %v3429_v8  ;;  %vm3866_vm3 = vmpackc.low %vm803_vm15, %vm4443_vm4  ;;  %vm781_vm15 = vcmask 97280   ;;  %vm784_vm4 = vcmask 670720  }
  0x24   :  { %2685 = vmatpush1.bf16.msra.mxu0 %v3333_v0 }
  0x25   :  { %2687 = vmatprep.subr.bf16.mxu0 %v3336_v1  ;;  %2699 = vmatpush1.bf16.msra.mxu1 %v3419_v3 }
  0x26   :  { %2700 = vmatprep.subr.bf16.mxu1 %v4417_v62 }
  0x28   :  { %2689 = vmatpush1.bf16.msra.mxu0 %v3351_v6 }
  0x29   :  { %2691 = vmatprep.subr.bf16.mxu0 %v3354_v7  ;;  %2702 = vmatpush1.bf16.msra.mxu1 %v3429_v8 }
  0x2a   :  { %2703 = vmatprep.subr.bf16.mxu1 %v4417_v62 }
  0x2c   :  { %2693 = vmatpush1.bf16.msra.mxu0 %v3363_v10 }
  0x75   :  { %v209_v11 = vpop.permute.xlu1 %208 }
  0x76   :  { %v2999_v13 = vpop.permute.xlu0 %2998 }
  0x77   :  { %v3000_v14 = vunpack.i.l.bf16 %v2999_v13  ;;  %v3001_v19 = vunpack.i.h.bf16 %v2999_v13 }
  0x79   :  { %v211_v15 = vpop.permute.xlu1 %210  ;;  %v221_v26 = vsel %vm220_vm0, %v152_v18, %v3000_v14  ;;  %v222_v35 = vsel %vm220_vm0, %v153_v25, %v3001_v19  ;;  %v133_v14 = vld [vmem:[%s4410_s5 + $0x40] sm:$0xff]  ;;  %v135_v19 = vld [vmem:[%s4410_s5 + $0x50] sm:$0xff]  ;;  %v138_v25 = vld [vmem:[%s4410_s5 + $0x68] sm:$0xff] }
  0x7a   :  { %v3004_v20 = vpop.permute.xlu0 %3003 }
  0x7b   :  { %v3006_v21 = vunpack.i.h.bf16 %v3004_v20  ;;  %v3005_v22 = vunpack.i.l.bf16 %v3004_v20  ;;  %v136_v20 = vld [vmem:[%s4410_s5 + $0x58] sm:$0xff] }
  0x7d   :  { %v197_v27 = vpop.permute.xlu1 %196  ;;  %v226_v29 = vsel %vm225_vm1, %v221_v26, %v3005_v22  ;;  %v227_v36 = vsel %vm225_vm1, %v222_v35, %v3006_v21  ;;  %v3459_v21 = vpack.c.bf16 %v136_v20, %v135_v19  ;;  %v137_v22 = vld [vmem:[%s4410_s5 + $0x60] sm:$0xff]  ;;  %v142_v35 = vld [vmem:[%s4410_s5 + $0x88] sm:$0x7] }
  0x7e   :  { %v181_v33 = vpop.permute.xlu0 %180  ;;  %v231_v34 = vsel %vm230_vm2, %v226_v29, %v209_v11  ;;  %v232_v44 = vsel %vm230_vm2, %v227_v36, %v211_v15  ;;  %v132_v11 = vld [vmem:[%s4410_s5 + $0x38] sm:$0xff]  ;;  %v134_v15 = vld [vmem:[%s4410_s5 + $0x48] sm:$0xff]  ;;  %v3469_v26 = vpack.c.bf16 %v138_v25, %v137_v22 }
  0x7f   :  { %323 = vmatmul.mubr.f32.vlgmr.msra.gmra.mrb[0].mxu0 %v231_v34  ;;  %v223_v37 = vsel %vm220_vm0, %v154_v28, %v181_v33  ;;  %v3439_v13 = vpack.c.bf16 %v132_v11, %v131_v9  ;;  %v3449_v18 = vpack.c.bf16 %v134_v15, %v133_v14  ;;  %4453 = vst [vmem:[#allocation10_spill] sm:$0xff] %v3459_v21  ;;  %v140_v28 = vld [vmem:[%s4410_s5 + $0x78] sm:$0xff]  ;;  %v141_v34 = vld [vmem:[%s4410_s5 + $0x80] sm:$0xff] }
  0x80   :  { %2313 = vmatprep.mubr.msk.f32.mxu0 %vm220_vm0, %v169_v30  ;;  %v228_v45 = vsel %vm225_vm1, %v223_v37, %v197_v27  ;;  %4454 = vst [vmem:[#allocation11_spill] sm:$0xff] %v3469_v26  ;;  %v139_v27 = vld [vmem:[%s4410_s5 + $0x70] sm:$0xff]  ;;  %v236_v30 = vlaneseq  ;;  %v3492_v36 = vpack.c.bf16 %v142_v35, %v141_v34  ;;  %v4457_v37 = vmov 0  ;;  %s3068_s5 = smov 12  }
  0x81   :  { %v183_v38 = vpop.permute.xlu1 %182  ;;  %4451 = vst [vmem:[#allocation8_spill] sm:$0xff] %v3439_v13  ;;  %2705 = vmatpush1.bf16.msra.mxu1 %v3439_v13  ;;  %4452 = vst [vmem:[#allocation9_spill] sm:$0xff] %v3449_v18  ;;  %v3479_v29 = vpack.c.bf16 %v140_v28, %v139_v27  ;;  %v4458_v37 = vsel %vm3495_vm5, 4294967295, %v4457_v37 }
  0x82   :  { %v213_v43 = vpop.permute.xlu0 %212  ;;  %v224_v48 = vsel %vm220_vm0, %v155_v41, %v183_v38  ;;  %2706 = vmatprep.subr.bf16.mxu1 %v4417_v62  ;;  %v3484_v33 = vshrl.u32 %v236_v30, 7  ;;  %4456 = vst [vmem:[#allocation13_spill] sm:$0xff] %v3492_v36  ;;  %4459 = vst [vmem:[#allocation14_spill] sm:$0xff] %v4458_v37  ;;  %v79_v41 = vld [vmem:[%s4407_s2] sm:$0x3]  ;;  %s3066_s2 = smov 127  }
  0x83   :  { %329 = vmatmul.mubr.f32.gmra.mrb[2].mxu0 %v232_v44  ;;  %v233_v51 = vsel %vm230_vm2, %v228_v45, %v213_v43  ;;  %4455 = vst [vmem:[#allocation12_spill] sm:$0xff] %v3479_v29 }
  0x84   :  { %2314 = vmatprep.mubr.msk.f32.mxu0 %vm220_vm0, %v170_v42  ;;  %v3500_v38 = vsub.s32 0, %v3484_v33  ;;  %v242_v42 = vsub.s32 1, %v3484_v33 }
  0x85   :  { %v215_v49 = vpop.permute.xlu1 %214  ;;  %2708 = vmatpush1.bf16.msra.mxu1 %v3449_v18 }
  0x86   :  { %v199_v54 = vpop.permute.xlu0 %198  ;;  %2709 = vmatprep.subr.bf16.mxu1 %v4417_v62  ;;  %v3510_v43 = vrot.slane %v79_v41, %v3500_v38  ;;  %v3512_v44 = vrot.slane %v79_v41, %v242_v42 }
  0x87   :  { %335 = vmatmul.mubr.f32.gmra.mrb[4].mxu0 %v233_v51  ;;  %v229_v55 = vsel %vm225_vm1, %v224_v48, %v199_v54 }
  0x88   :  { %2315 = vmatprep.mubr.msk.f32.mxu0 %vm220_vm0, %v171_v50  ;;  %v234_v56 = vsel %vm230_vm2, %v229_v55, %v215_v49  ;;  %4460 = vst [vmem:[#allocation15_spill] sm:$0xff] %v3510_v43  ;;  %4461 = vst [vmem:[#allocation16_spill] sm:$0xff] %v3512_v44 }
  0x89   :  { %2711 = vmatpush1.bf16.msra.mxu1 %v3459_v21 }
  0x8a   :  { %2712 = vmatprep.subr.bf16.mxu1 %v4417_v62 }
  0x8b   :  { %341 = vmatmul.mubr.f32.gmra.mrb[6].mxu0 %v234_v56 }
  0x8d   :  { %2714 = vmatpush1.bf16.msra.mxu1 %v3469_v26 }
  0x8e   :  { %2715 = vmatprep.subr.bf16.mxu1 %v4417_v62 }
  0x91   :  { %2717 = vmatpush1.bf16.msra.mxu1 %v3479_v29 }
  0x92   :  { %2718 = vmatprep.subr.bf16.mxu1 %v4417_v62 }
  0x95   :  { %2721 = vmatpush1.bf16.msk.msra.mxu1 %vm3495_vm5, %v3492_v36 }
 0x152   :  { %v324_v45 = vpop.f32.mrb[0].mxu0 }
 0x153   :  { %v325_v48 = vadd.f32 %v324_v45, %v3510_v43  ;;  %v326_v49 = vpop.f32.mrb[1].mxu0 }
 0x154   :  { %v327_v50 = vadd.f32 %v326_v49, %v3512_v44 }
 0x155   :  { %v347_v51 = vmax.f32 %v325_v48, 0.0 }
 0x156   :  { %v348_v54 = vmax.f32 %v327_v50, 0.0  ;;  %v330_v55 = vpop.f32.mrb[2].mxu0 }
 0x157   :  { %v331_v56 = vadd.f32 %v330_v55, %v3510_v43  ;;  %v332_v57 = vpop.f32.mrb[3].mxu0  ;;  %363 = vrot.lane.b32.xlu0 %v347_v51, %s3066_s2 }
 0x158   :  { %v333_v60 = vadd.f32 %v332_v57, %v3512_v44  ;;  %365 = vrot.lane.b32.xlu1 %v348_v54, %s3066_s2 }
 0x159   :  { %v349_v61 = vmax.f32 %v331_v56, 0.0 }
 0x15a   :  { %v350_v2 = vmax.f32 %v333_v60, 0.0  ;;  %v336_v4 = vpop.f32.mrb[4].mxu0 }
 0x15b   :  { %v337_v5 = vadd.f32 %v336_v4, %v3510_v43  ;;  %v338_v9 = vpop.f32.mrb[5].mxu0  ;;  %367 = vrot.lane.b32.xlu0 %v349_v61, %s3066_s2 }
 0x15c   :  { %v339_v11 = vadd.f32 %v338_v9, %v3512_v44  ;;  %369 = vrot.lane.b32.xlu1 %v350_v2, %s3066_s2 }
 0x15d   :  { %v351_v14 = vmax.f32 %v337_v5, 0.0 }
 0x15e   :  { %v352_v15 = vmax.f32 %v339_v11, 0.0  ;;  %v342_v19 = vpop.f32.mrb[6].mxu0 }
 0x15f   :  { %v343_v20 = vadd.f32 %v342_v19, %v3510_v43  ;;  %v344_v22 = vpop.f32.mrb[7].mxu0  ;;  %371 = vrot.lane.b32.xlu0 %v351_v14, %s3066_s2  ;;  %v121_v43 = vld [vmem:[%s4408_s3 + $0x148] sm:$0xff] }
 0x160   :  { %v345_v25 = vadd.f32 %v344_v22, %v3512_v44  ;;  %373 = vrot.lane.b32.xlu1 %v352_v15, %s3066_s2  ;;  %v98_v22 = vld [vmem:[%s4408_s3 + $0x90] sm:$0xff]  ;;  %v120_v44 = vld [vmem:[%s4408_s3 + $0x140] sm:$0xff] }
 0x161   :  { %v353_v27 = vmax.f32 %v343_v20, 0.0  ;;  %v81_v20 = vld [vmem:[%s4408_s3 + $0x8] sm:$0xff] }
 0x162   :  { %v354_v28 = vmax.f32 %v345_v25, 0.0  ;;  %v99_v25 = vld [vmem:[%s4408_s3 + $0x98] sm:$0xff] }
 0x163   :  { %375 = vrot.lane.b32.xlu0 %v353_v27, %s3066_s2 }
 0x164   :  { %377 = vrot.lane.b32.xlu1 %v354_v28, %s3066_s2 }
 0x1c9   :  { %v364_v30 = vpop.permute.xlu0 %363 }
 0x1ca   :  { %v366_v34 = vpop.permute.xlu1 %365 }
 0x1cb   :  { %v380_v35 = vsel %vm379_vm6, %v364_v30, %v366_v34  ;;  %v393_v41 = vmax.f32 %v348_v54, %v366_v34  ;;  %v82_v30 = vld [vmem:[%s4408_s3 + $0x10] sm:$0xff]  ;;  %v83_v34 = vld [vmem:[%s4408_s3 + $0x18] sm:$0xff] }
 0x1cc   :  { %v392_v42 = vmax.f32 %v347_v51, %v380_v35  ;;  %v100_v35 = vld [vmem:[%s4408_s3 + $0xa0] sm:$0xff] }
 0x1cd   :  { %2317 = vmatprep.mubr.msk.f32.mxu1 %vm400_vm7, %v393_v41  ;;  %v368_v45 = vpop.permute.xlu0 %367  ;;  %v101_v41 = vld [vmem:[%s4408_s3 + $0xa8] sm:$0xff] }
 0x1ce   :  { %v370_v48 = vpop.permute.xlu1 %369  ;;  %482 = vmatmul.mubr.f32.vlgmr.msra.gmra.mrb[0].mxu1 %v392_v42  ;;  %v3576_v42 = vpack.c.bf16 %v83_v34, %v82_v30  ;;  %v88_v34 = vld [vmem:[%s4408_s3 + $0x40] sm:$0xff] }
 0x1cf   :  { %v381_v49 = vsel %vm379_vm6, %v368_v45, %v370_v48  ;;  %v395_v50 = vmax.f32 %v350_v2, %v370_v48  ;;  %v97_v2 = vld [vmem:[%s4408_s3 + $0x88] sm:$0xff]  ;;  %v3579_v45 = vpack.c.bf16 %v101_v41, %v100_v35  ;;  %v84_v48 = vld [vmem:[%s4408_s3 + $0x20] sm:$0xff]  ;;  %v106_v41 = vld [vmem:[%s4408_s3 + $0xd0] sm:$0xff] }
 0x1d0   :  { %v394_v55 = vmax.f32 %v349_v61, %v381_v49  ;;  %v96_v61 = vld [vmem:[%s4408_s3 + $0x80] sm:$0xff]  ;;  %v85_v49 = vld [vmem:[%s4408_s3 + $0x28] sm:$0xff] }
 0x1d1   :  { %2318 = vmatprep.mubr.msk.f32.mxu1 %vm400_vm7, %v395_v50  ;;  %v372_v56 = vpop.permute.xlu0 %371  ;;  %v102_v50 = vld [vmem:[%s4408_s3 + $0xb0] sm:$0xff]  ;;  %v89_v35 = vld [vmem:[%s4408_s3 + $0x48] sm:$0xff] }
 0x1d2   :  { %v374_v57 = vpop.permute.xlu1 %373  ;;  %487 = vmatmul.mubr.f32.gmra.mrb[2].mxu1 %v394_v55  ;;  %v103_v55 = vld [vmem:[%s4408_s3 + $0xb8] sm:$0xff] }
 0x1d3   :  { %v382_v60 = vsel %vm379_vm6, %v372_v56, %v374_v57  ;;  %v397_v4 = vmax.f32 %v352_v15, %v374_v57  ;;  %v3547_v15 = vpack.c.bf16 %v97_v2, %v96_v61  ;;  %v112_v56 = vld [vmem:[%s4408_s3 + $0x100] sm:$0xff]  ;;  %v113_v57 = vld [vmem:[%s4408_s3 + $0x108] sm:$0xff] }
 0x1d4   :  { %v396_v5 = vmax.f32 %v351_v14, %v382_v60  ;;  %v80_v14 = vld [vmem:[%s4408_s3] sm:$0xff]  ;;  %v3599_v60 = vpack.c.bf16 %v113_v57, %v112_v56  ;;  %v105_v2 = vld [vmem:[%s4408_s3 + $0xc8] sm:$0xff]  ;;  %v91_v56 = vld [vmem:[%s4408_s3 + $0x58] sm:$0xff] }
 0x1d5   :  { %2319 = vmatprep.mubr.msk.f32.mxu1 %vm400_vm7, %v397_v4  ;;  %v376_v51 = vpop.permute.xlu0 %375  ;;  %2723 = vmatprep.subr.bf16.mxu1 %v3547_v15  ;;  %v3602_v4 = vpack.c.bf16 %v85_v49, %v84_v48  ;;  %v107_v48 = vld [vmem:[%s4408_s3 + $0xd8] sm:$0xff]  ;;  %v3659_v49 = vpack.c.bf16 %v89_v35, %v88_v34  ;;  %v108_v57 = vld [vmem:[%s4408_s3 + $0xe0] sm:$0xff] }
 0x1d6   :  { %v378_v54 = vpop.permute.xlu1 %377  ;;  %492 = vmatmul.mubr.f32.gmra.mrb[4].mxu1 %v396_v5  ;;  %4462 = vst [vmem:[#allocation17_spill] sm:$0xff] %v3599_v60  ;;  %v114_v5 = vld [vmem:[%s4408_s3 + $0x110] sm:$0xff]  ;;  %2755 = vmatprep.subr.bf16.mxu0 %v3599_v60 }
 0x1d7   :  { %v399_v9 = vmax.f32 %v354_v28, %v378_v54  ;;  %v383_v11 = vsel %vm379_vm6, %v376_v51, %v378_v54  ;;  %v3560_v28 = vpack.c.bf16 %v99_v25, %v98_v22  ;;  %v115_v51 = vld [vmem:[%s4408_s3 + $0x118] sm:$0xff]  ;;  %v3611_v54 = vpack.c.bf16 %v103_v55, %v102_v50  ;;  %2757 = vmatpush3.bf16.msra.mxu0 %v3599_v60  ;;  %v90_v55 = vld [vmem:[%s4408_s3 + $0x50] sm:$0xff] }
 0x1d8   :  { %v398_v19 = vmax.f32 %v353_v27, %v383_v11  ;;  %v3558_v27 = vpack.c.bf16 %v81_v20, %v80_v14  ;;  %v87_v11 = vld [vmem:[%s4408_s3 + $0x38] sm:$0xff]  ;;  %v3623_v61 = vpack.c.bf16 %v115_v51, %v114_v5  ;;  %v116_v14 = vld [vmem:[%s4408_s3 + $0x120] sm:$0xff]  ;;  %v117_v20 = vld [vmem:[%s4408_s3 + $0x128] sm:$0xff]  ;;  %v3662_v50 = vpack.c.bf16 %v107_v48, %v106_v41 }
 0x1d9   :  { %2320 = vmatprep.mubr.msk.f32.mxu1 %vm400_vm7, %v399_v9  ;;  %v86_v9 = vld [vmem:[%s4408_s3 + $0x30] sm:$0xff]  ;;  %v3636_v22 = vpack.c.bf16 %v117_v20, %v116_v14  ;;  %v109_v5 = vld [vmem:[%s4408_s3 + $0xe8] sm:$0xff]  ;;  %v3678_v51 = vpack.c.bf16 %v91_v56, %v90_v55 }
 0x1da   :  { %497 = vmatmul.mubr.f32.gmra.mrb[6].mxu1 %v398_v19  ;;  %v104_v19 = vld [vmem:[%s4408_s3 + $0xc0] sm:$0xff]  ;;  %4463 = vst [vmem:[#allocation18_spill] sm:$0xff] %v3623_v61  ;;  %2759 = vmatprep.subr.bf16.mxu0 %v3623_v61  ;;  %v3639_v25 = vpack.c.bf16 %v87_v11, %v86_v9  ;;  %v3681_v9 = vpack.c.bf16 %v109_v5, %v108_v57  ;;  %v3067_v11 = vmov 1983009808  }
 0x1db   :  { %2725 = vmatpush3.bf16.msra.mxu1 %v3558_v27  ;;  %4464 = vst [vmem:[#allocation19_spill] sm:$0xff] %v3636_v22  ;;  %v3642_v30 = vpack.c.bf16 %v105_v2, %v104_v19  ;;  %2761 = vmatpush3.bf16.msra.mxu0 %v3623_v61  ;;  %4465 = vst [vmem:[#allocation20_spill] sm:$0xff] %v3678_v51  ;;  %v508_v19 = vunpack.c.l.s4 %v3067_v11 }
 0x1dc   :  { %2727 = vmatprep.subr.bf16.mxu1 %v3560_v28  ;;  %2763 = vmatprep.subr.bf16.mxu0 %v3636_v22  ;;  %4466 = vst [vmem:[#allocation21_spill] sm:$0xff] %v3681_v9 }
 0x1dd   :  { %v509_v2 = vunpack.c.0.s8 %v508_v19 }
 0x1df   :  { %2729 = vmatpush3.bf16.msra.mxu1 %v3576_v42  ;;  %2765 = vmatpush3.bf16.msra.mxu0 %v3636_v22  ;;  %v3686_v14 = vsub.s32 %v509_v2, %v3484_v33 }
 0x1e0   :  { %2731 = vmatprep.subr.bf16.mxu1 %v3579_v45 }
 0x1e1   :  { %4467 = vst [vmem:[#allocation22_spill] sm:$0xff] %v3686_v14 }
 0x1e3   :  { %2733 = vmatpush3.bf16.msra.mxu1 %v3602_v4 }
 0x1e4   :  { %2735 = vmatprep.subr.bf16.mxu1 %v3611_v54 }
 0x1e7   :  { %2737 = vmatpush3.bf16.msra.mxu1 %v3639_v25 }
 0x1e8   :  { %2739 = vmatprep.subr.bf16.mxu1 %v3642_v30 }
 0x1eb   :  { %2741 = vmatpush3.bf16.msra.mxu1 %v3659_v49 }
 0x1ec   :  { %2743 = vmatprep.subr.bf16.mxu1 %v3662_v50 }
 0x1ef   :  { %2745 = vmatpush3.bf16.msra.mxu1 %v3678_v51 }
 0x1f0   :  { %2747 = vmatprep.subr.bf16.mxu1 %v3681_v9 }
 0x2a1   :  { %v483_v20 = vpop.f32.mrb[0].mxu1 }
 0x2a2   :  { %v506_v34 = vcombine.high %v483_v20, %v483_v20  ;;  %v513_v35 = vrot.slane %v483_v20, %v3686_v14  ;;  %v485_v41 = vpop.f32.mrb[1].mxu1 }
 0x2a4   :  { %v520_v48 = vrot.slane %v506_v34, %v3686_v14  ;;  %v521_v55 = vcombine.high %v513_v35, %v513_v35  ;;  %v2321_v56 = vrot.slane %v513_v35, 9 }
 0x2a5   :  { %v488_v57 = vpop.f32.mrb[2].mxu1 }
 0x2a6   :  { %v522_v5 = vcombine.high %v520_v48, %v520_v48  ;;  %v2322_v62 = vrot.slane %v521_v55, 9  ;;  %v2323_v22 = vrot.slane %v520_v48, 9  ;;  %v621_v61 = vmax.f32 %v513_v35, %v2321_v56  ;;  %v490_v60 = vpop.f32.mrb[3].mxu1 }
 0x2a7   :  { %v523_v11 = vcombine.high %v488_v57, %v488_v57  ;;  %v530_v33 = vrot.slane %v488_v57, %v3686_v14 }
 0x2a8   :  { %v2324_v19 = vrot.slane %v522_v5, 9  ;;  %v622_v2 = vmax.f32 %v521_v55, %v2322_v62  ;;  %v623_v37 = vmax.f32 %v520_v48, %v2323_v22  ;;  %v648_v20 = vrot.slane %v621_v61, %v3500_v38 }
 0x2a9   :  { %v537_v34 = vrot.slane %v523_v11, %v3686_v14  ;;  %v538_v41 = vcombine.high %v530_v33, %v530_v33  ;;  %v2325_v36 = vrot.slane %v530_v33, 9  ;;  %v493_v29 = vpop.f32.mrb[4].mxu1 }
 0x2aa   :  { %v624_v26 = vmax.f32 %v522_v5, %v2324_v19  ;;  %v652_v35 = vrot.slane %v622_v2, %v3500_v38  ;;  %v656_v60 = vrot.slane %v623_v37, %v3500_v38  ;;  %v540_v56 = vcombine.high %v493_v29, %v493_v29  ;;  %v495_v21 = vpop.f32.mrb[5].mxu1 }
 0x2ab   :  { %v539_v57 = vcombine.high %v537_v34, %v537_v34  ;;  %v2326_v18 = vrot.slane %v538_v41, 9  ;;  %v2327_v62 = vrot.slane %v537_v34, 9  ;;  %v625_v22 = vmax.f32 %v530_v33, %v2325_v36 }
 0x2ac   :  { %v3696_v61 = vrot.slane %v624_v26, %v3500_v38  ;;  %v686_v48 = vsel %vm685_vm8, %v652_v35, %v648_v20  ;;  %v707_v55 = vsel %vm685_vm8, %v656_v60, %v652_v35  ;;  %v547_v5 = vrot.slane %v493_v29, %v3686_v14 }
 0x2ad   :  { %v3702_v11 = vsel %vm687_vm9, %v656_v60, %v686_v48  ;;  %v2328_v37 = vrot.slane %v539_v57, 9  ;;  %v626_v21 = vmax.f32 %v538_v41, %v2326_v18  ;;  %v627_v19 = vmax.f32 %v537_v34, %v2327_v62  ;;  %v498_v2 = vpop.f32.mrb[6].mxu1 }
 0x2ae   :  { %v726_v36 = vsel %vm685_vm8, %v3696_v61, %v656_v60  ;;  %v3707_v33 = vrot.slane %v625_v22, %v3500_v38  ;;  %v554_v26 = vrot.slane %v540_v56, %v3686_v14  ;;  %v555_v20 = vcombine.high %v547_v5, %v547_v5  ;;  %v500_v13 = vpop.f32.mrb[7].mxu1 }
 0x2af   :  { %v628_v35 = vmax.f32 %v539_v57, %v2328_v37  ;;  %v3711_v29 = vrot.slane %v626_v21, %v3500_v38  ;;  %v2329_v48 = vrot.slane %v547_v5, 9  ;;  %v563_v41 = vrot.slane %v498_v2, %v3686_v14 }
 0x2b0   :  { %v556_v8 = vcombine.high %v554_v26, %v554_v26  ;;  %v2330_v18 = vrot.slane %v555_v20, 9  ;;  %v2331_v34 = vrot.slane %v554_v26, 9  ;;  %v3715_v60 = vrot.slane %v627_v19, %v3500_v38 }
 0x2b1   :  { %v629_v62 = vmax.f32 %v547_v5, %v2329_v48  ;;  %v727_v56 = vsel %vm687_vm9, %v3707_v33, %v726_v36  ;;  %v708_v13 = vsel %vm687_vm9, %v3696_v61, %v707_v55  ;;  %v3722_v57 = vrot.slane %v628_v35, %v3500_v38 }
 0x2b2   :  { %v630_v22 = vmax.f32 %v555_v20, %v2330_v18  ;;  %v631_v37 = vmax.f32 %v554_v26, %v2331_v34  ;;  %v2333_v21 = vrot.slane %v563_v41, 9  ;;  %v728_v19 = vsel %vm689_vm10, %v3711_v29, %v727_v56 }
 0x2b3   :  { %v3725_v3 = vrot.slane %v629_v62, %v3500_v38  ;;  %v709_v5 = vsel %vm689_vm10, %v3707_v33, %v708_v13  ;;  %v2332_v2 = vrot.slane %v556_v8, 9  ;;  %v564_v35 = vcombine.high %v563_v41, %v563_v41 }
 0x2b4   :  { %v3732_v36 = vrot.slane %v630_v22, %v3500_v38  ;;  %v706_v55 = vrot.slane %v631_v37, %v3500_v38  ;;  %v729_v26 = vsel %vm691_vm11, %v3715_v60, %v728_v19  ;;  %v710_v20 = vsel %vm691_vm11, %v3711_v29, %v709_v5 }
 0x2b5   :  { %v632_v48 = vmax.f32 %v556_v8, %v2332_v2  ;;  %v745_v18 = vsel %vm685_vm8, %v3707_v33, %v3696_v61  ;;  %v633_v34 = vmax.f32 %v563_v41, %v2333_v21  ;;  %v730_v62 = vsel %vm4446_vm12, %v3722_v57, %v729_v26  ;;  %v92_v21 = vld [vmem:[%s4408_s3 + $0x60] sm:$0xff] }
 0x2b6   :  { %v711_v56 = vsel %vm4446_vm12, %v3715_v60, %v710_v20  ;;  %v714_v13 = vsel %vm685_vm8, %v706_v55, %v3732_v36  ;;  %v731_v22 = vsel %vm4445_vm13, %v3725_v3, %v730_v62  ;;  %v746_v41 = vsel %vm687_vm9, %v3711_v29, %v745_v18  ;;  %v93_v20 = vld [vmem:[%s4408_s3 + $0x68] sm:$0xff]  ;;  %v111_v18 = vld [vmem:[%s4408_s3 + $0xf8] sm:$0xff] }
 0x2b7   :  { %v712_v8 = vsel %vm4445_vm13, %v3722_v57, %v711_v56  ;;  %v725_v37 = vrot.slane %v632_v48, %v3500_v38  ;;  %v732_v19 = vsel %vm4444_vm14, %v3732_v36, %v731_v22  ;;  %v747_v2 = vsel %vm689_vm10, %v3715_v60, %v746_v41  ;;  %v110_v48 = vld [vmem:[%s4408_s3 + $0xf0] sm:$0xff] }
 0x2b8   :  { %v713_v5 = vsel %vm4444_vm14, %v3725_v3, %v712_v8  ;;  %v764_v26 = vsel %vm685_vm8, %v3711_v29, %v3707_v33  ;;  %734 = vrot.lane.b32.xlu1 %v732_v19, %s3068_s5  ;;  %v748_v56 = vsel %vm691_vm11, %v3722_v57, %v747_v2  ;;  %v118_v8 = vld [vmem:[%s4408_s3 + $0x130] sm:$0xff]  ;;  %v2334_v41 = vrot.slane %v564_v35, 9  ;;  %v95_v2 = vld [vmem:[%s4408_s3 + $0x78] sm:$0xff] }
 0x2b9   :  { %v3007_v62 = vpack.i.bf16 %v714_v13, %v713_v5  ;;  %v765_v22 = vsel %vm687_vm9, %v3715_v60, %v764_v26  ;;  %v749_v14 = vsel %vm4446_vm12, %v3725_v3, %v748_v56  ;;  %v744_v19 = vrot.slane %v633_v34, %v3500_v38  ;;  %v119_v13 = vld [vmem:[%s4408_s3 + $0x138] sm:$0xff]  ;;  %v94_v5 = vld [vmem:[%s4408_s3 + $0x70] sm:$0xff] }
 0x2ba   :  { %v766_v63 = vsel %vm689_vm10, %v3722_v57, %v765_v22  ;;  %v750_v26 = vsel %vm4445_vm13, %v3732_v36, %v749_v14  ;;  %v3803_v56 = vpack.c.bf16 %v93_v20, %v92_v21  ;;  %v3805_v22 = vpack.c.bf16 %v111_v18, %v110_v48  ;;  %v2351_v20 = vld [vmem:[%s4405_s0 + $0x21] sm:$0xff] }
 0x2bb   :  { %3008 = vrot.lane.b32.xlu0 %v3007_v62, %s3069_s18  ;;  %v767_v34 = vsel %vm691_vm11, %v3725_v3, %v766_v63  ;;  %v733_v62 = vsel %vm685_vm8, %v725_v37, %v706_v55  ;;  %v751_v9 = vsel %vm4444_vm14, %v706_v55, %v750_v26  ;;  %v752_v63 = vsel %vm685_vm8, %v744_v19, %v725_v37 }
 0x2bc   :  { %v768_v14 = vsel %vm4446_vm12, %v3732_v36, %v767_v34  ;;  %736 = vrot.lane.b32.xlu1 %v733_v62, %s3068_s5  ;;  %2749 = vmatpush3.bf16.msra.mxu1 %v3803_v56  ;;  %v3824_v48 = vpack.c.bf16 %v119_v13, %v118_v8  ;;  %v3826_v18 = vpack.c.bf16 %v95_v2, %v94_v5  ;;  %v2352_v34 = vld [vmem:[%s4405_s0 + $0x29] sm:$0xff]  ;;  %v123_v8 = vld [vmem:[%s4408_s3 + $0x158] sm:$0x3f] }
 0x2bd   :  { %v769_v21 = vsel %vm4445_vm13, %v706_v55, %v768_v14  ;;  %v634_v26 = vmax.f32 %v564_v35, %v2334_v41  ;;  %2751 = vmatprep.subr.bf16.mxu1 %v3805_v22  ;;  %v3833_v55 = vpack.c.bf16 %v121_v43, %v120_v44  ;;  %v122_v62 = vld [vmem:[%s4408_s3 + $0x150] sm:$0xff]  ;;  %v690_v35 = vsel %vm689_vm10, %v3696_v61, %v3702_v11  ;;  %s3071_s3 = smov 24   ;;  %v2358_v2 = vld [vmem:[%s4405_s0 + $0x3a] sm:$0xf] }
 0x2be   :  { %v770_v51 = vsel %vm4444_vm14, %v725_v37, %v769_v21  ;;  %2767 = vmatprep.subr.bf16.mxu0 %v3824_v48  ;;  %v692_v43 = vsel %vm691_vm11, %v3707_v33, %v690_v35  ;;  %v3852_v44 = vsel %vm685_vm8, %v3732_v36, %v3725_v3  ;;  %v3858_v11 = vpack.c.bf16 %v123_v8, %v122_v62  ;;  %v2353_v41 = vld [vmem:[%s4405_s0 + $0x31] sm:$0xff]  ;;  %v2354_v14 = vld [vmem:[%s4405_s0 + $0x39] sm:$0xf] }
 0x2bf   :  { %753 = vrot.lane.b32.xlu0 %v751_v9, %s3070_s13  ;;  %2769 = vmatpush3.bf16.msra.mxu0 %v3824_v48  ;;  %v3012_v9 = vpack.i.bf16 %v2352_v34, %v2351_v20  ;;  %v694_v61 = vsel %vm4446_vm12, %v3711_v29, %v692_v43  ;;  %v763_v37 = vrot.slane %v634_v26, %v3500_v38  ;;  %v2355_v29 = vld [vmem:[%s4405_s0 + $0x22] sm:$0xff]  ;;  %v2361_v13 = vld [vmem:[%s4405_s0 + $0x33] sm:$0xff]  ;;  %vm796_vm12 = vcmask 769024  }
 0x2c0   :  { %772 = vrot.lane.b32.xlu1 %v770_v51, %s3071_s3  ;;  %2753 = vmatpush3.bf16.msra.mxu1 %v3826_v18  ;;  %v696_v3 = vsel %vm4445_vm13, %v3715_v60, %v694_v61  ;;  %v2357_v5 = vld [vmem:[%s4405_s0 + $0x32] sm:$0xff]  ;;  %vm787_vm13 = vcmask 195584  }
 0x2c1   :  { %2771 = vmatprep.subr.bf16.mxu0 %v3833_v55  ;;  %2797 = vmatprep.subr.bf16.mxu1 %v3170_v12  ;;  %v698_v33 = vsel %vm4444_vm14, %v3722_v57, %v696_v3  ;;  %v2356_v12 = vld [vmem:[%s4405_s0 + $0x2a] sm:$0xff]  ;;  %v771_v60 = vsel %vm685_vm8, %v763_v37, %v744_v19  ;;  %vm778_vm14 = vcmask 572416  }
 0x2c2   :  { %v2359_v57 = vld [vmem:[%s4405_s0 + $0x23] sm:$0xff]  ;;  %v3017_v36 = vpack.i.bf16 %v2356_v12, %v2355_v29  ;;  %v2360_v19 = vld [vmem:[%s4405_s0 + $0x2b] sm:$0xff] }
 0x2c3   :  { %755 = vrot.lane.b32.xlu0 %v752_v63, %s3070_s13  ;;  %2773 = vmatpush3.bf16.msra.mxu0 %v3833_v55  ;;  %v2362_v63 = vld [vmem:[%s4405_s0 + $0x3b] sm:$0xf] }
 0x2c4   :  { %3013 = vrot.lane.b32.xlu1 %v3012_v9, %s3062_s30  ;;  %2776 = vmatprep.subr.msk.bf16.mxu0 %vm3866_vm3, %v3858_v11 }
 0x2c7   :  { %774 = vrot.lane.b32.xlu0 %v771_v60, %s3071_s3  ;;  %2779 = vmatpush3.bf16.msk.msra.mxu0 %vm3866_vm3, %v3858_v11  ;;  %v2363_v60 = vld [vmem:[%s4405_s0 + $0x24] sm:$0xff] }
 0x2c8   :  { %1201 = vrot.lane.b32.xlu1 %v2359_v57, %s3061_s23 }
 0x2cb   :  { %3018 = vrot.lane.b32.xlu0 %v3017_v36, %s3063_s15 }
 0x2cc   :  { %1173 = vrot.lane.b32.xlu1 %v2353_v41, %s3062_s30 }
 0x2cf   :  { %1203 = vrot.lane.b32.xlu0 %v2360_v19, %s3061_s23 }
 0x2d0   :  { %1205 = vrot.lane.b32.xlu1 %v2361_v13, %s3061_s23  ;;  %v2350_v13 = vld [vmem:[%s4405_s0 + $0x38] sm:$0xf] }
 0x2d3   :  { %1189 = vrot.lane.b32.xlu0 %v2357_v5, %s3063_s15 }
 0x2d4   :  { %1191 = vrot.lane.b32.xlu1 %v2358_v2, %s3063_s15 }
 0x2d7   :  { %1175 = vrot.lane.b32.xlu0 %v2354_v14, %s3062_s30 }
 0x2db   :  { %1207 = vrot.lane.b32.xlu0 %v2362_v63, %s3061_s23 }
 0x32a   :  { %v735_v21 = vpop.permute.xlu1 %734 }
 0x32d   :  { %v3009_v20 = vpop.permute.xlu0 %3008 }
 0x32e   :  { %v3010_v26 = vunpack.i.l.bf16 %v3009_v20  ;;  %v737_v34 = vpop.permute.xlu1 %736  ;;  %v3011_v8 = vunpack.i.h.bf16 %v3009_v20 }
 0x330   :  { %v782_v62 = vsel %vm781_vm15, %v3010_v26, %v735_v21  ;;  %v779_v61 = vsel %vm778_vm14, %v698_v33, %v3010_v26  ;;  %v783_v3 = vsel %vm781_vm15, %v3011_v8, %v737_v34  ;;  %v780_v33 = vsel %vm778_vm14, %v3852_v44, %v3011_v8  ;;  %v2366_v26 = vld [vmem:[%s4405_s0 + $0x3c] sm:$0xf]  ;;  %v149_v34 = vld [vmem:[%s4411_s6 + $0x30] sm:$0xff] }
 0x331   :  { %v754_v35 = vpop.permute.xlu0 %753 }
 0x332   :  { %v785_v43 = vsel %vm784_vm4, %v782_v62, %v754_v35  ;;  %v773_v9 = vpop.permute.xlu1 %772  ;;  %v150_v62 = vld [vmem:[%s4411_s6 + $0x38] sm:$0xff] }
 0x333   :  { %871 = vmatprep.mubr.f32.mxu1 %v785_v43  ;;  %v788_v37 = vsel %vm787_vm13, %v754_v35, %v773_v9  ;;  %v4044_v8 = vpack.c.bf16 %v150_v62, %v149_v34  ;;  %v4052_v43 = vld [vmem:[%s4411_s6 + $0x40] sm:$0x1f]  ;;  %v4481_v34 = vld [vmem:[#allocation11_spill] sm:$0xff] }
 0x334   :  { %872 = vmatmul.mubr.f32.vlgmr.msra.gmra.mrb[8].mxu1 %v779_v61  ;;  %2565 = vmatprep.mubr.msk.f32.mxu0 %vm796_vm12, %v788_v37  ;;  %v4472_v37 = vmov 0.0|0.0  }
 0x335   :  { %2799 = vmatpush1.bf16.msra.mxu1 %v3181_v16  ;;  %v756_v29 = vpop.permute.xlu0 %755 }
 0x336   :  { %v786_v12 = vsel %vm784_vm4, %v783_v3, %v756_v29  ;;  %2801 = vmatprep.subr.bf16.mxu1 %v3183_v17  ;;  %v3014_v17 = vpop.permute.xlu1 %3013 }
 0x337   :  { %876 = vmatprep.mubr.f32.mxu1 %v786_v12 }
 0x338   :  { %877 = vmatmul.mubr.f32.gmra.mrb[10].mxu1 %v780_v33 }
 0x339   :  { %2803 = vmatpush1.bf16.msra.mxu1 %v3203_v23  ;;  %v775_v57 = vpop.permute.xlu0 %774  ;;  %2367 = vmatprep.mubr.msk.f32.mxu1 %vm220_vm0, %v2363_v60 }
 0x33a   :  { %v789_v16 = vsel %vm787_vm13, %v756_v29, %v775_v57  ;;  %2805 = vmatprep.subr.bf16.mxu1 %v3207_v24  ;;  %v1202_v24 = vpop.permute.xlu1 %1201  ;;  %v4062_v29 = vld [vmem:[%s4409_s4] ss:$0 sm:$0xff] }
 0x33b   :  { %2566 = vmatmul.mubr.msk.f32.vlgmr.msra.gmra.mrb[8].mxu0 %vm796_vm12, %v789_v16 }
 0x33d   :  { %2807 = vmatpush1.bf16.msra.mxu1 %v3229_v31  ;;  %v3019_v23 = vpop.permute.xlu0 %3018  ;;  %v3015_v31 = vunpack.i.l.bf16 %v3014_v17 }
 0x33e   :  { %2809 = vmatprep.subr.bf16.mxu1 %v3233_v32  ;;  %v2347_v32 = vld [vmem:[%s4405_s0 + $0x20] sm:$0xff] }
 0x341   :  { %2811 = vmatpush1.bf16.msra.mxu1 %v3255_v39  ;;  %v1204_v39 = vpop.permute.xlu0 %1203 }
 0x342   :  { %2813 = vmatprep.subr.bf16.mxu1 %v3259_v40  ;;  %v3020_v40 = vunpack.i.l.bf16 %v3019_v23 }
 0x345   :  { %2815 = vmatpush1.bf16.msra.mxu1 %v3279_v46  ;;  %v3016_v46 = vunpack.i.h.bf16 %v3014_v17  ;;  %v1190_v44 = vpop.permute.xlu0 %1189 }
 0x346   :  { %2817 = vmatprep.subr.bf16.mxu1 %v3282_v47  ;;  %v1213_v47 = vsel %vm220_vm0, %v2347_v32, %v3015_v31 }
 0x349   :  { %2819 = vmatpush1.bf16.msra.mxu1 %v3297_v52  ;;  %v1174_v52 = vpop.permute.xlu1 %1173  ;;  %v1176_v5 = vpop.permute.xlu0 %1175 }
 0x34a   :  { %2821 = vmatprep.subr.bf16.mxu1 %v3300_v53  ;;  %v2348_v53 = vld [vmem:[%s4405_s0 + $0x28] sm:$0xff]  ;;  %v1216_v14 = vsel %vm220_vm0, %v2350_v13, %v1176_v5 }
 0x34d   :  { %2823 = vmatpush1.bf16.msra.mxu1 %v3315_v58  ;;  %v3021_v58 = vunpack.i.h.bf16 %v3019_v23  ;;  %v1206_v41 = vpop.permute.xlu1 %1205  ;;  %v1208_v20 = vpop.permute.xlu0 %1207 }
 0x34e   :  { %2825 = vmatprep.subr.bf16.mxu1 %v3318_v59  ;;  %v1217_v59 = vsel %vm225_vm1, %v1213_v47, %v3020_v40  ;;  %v4473_v40 = vld [vmem:[#allocation15_spill] sm:$0xff] }
 0x34f   :  { %v1221_v36 = vsel %vm230_vm2, %v1217_v59, %v1202_v24 }
 0x351   :  { %2827 = vmatpush1.bf16.msra.mxu1 %v3333_v0  ;;  %v1214_v0 = vsel %vm220_vm0, %v2348_v53, %v3016_v46  ;;  %v1192_v63 = vpop.permute.xlu1 %1191 }
 0x352   :  { %2829 = vmatprep.subr.bf16.mxu1 %v3336_v1  ;;  %v2349_v1 = vld [vmem:[%s4405_s0 + $0x30] sm:$0xff] }
 0x353   :  { %v1215_v19 = vsel %vm220_vm0, %v2349_v1, %v1174_v52  ;;  %v4474_v52 = vld [vmem:[#allocation16_spill] sm:$0xff] }
 0x354   :  { %v1219_v2 = vsel %vm225_vm1, %v1215_v19, %v1190_v44 }
 0x355   :  { %2831 = vmatpush1.bf16.msra.mxu1 %v3351_v6  ;;  %v2364_v6 = vld [vmem:[%s4405_s0 + $0x2c] sm:$0xff]  ;;  %v1223_v21 = vsel %vm230_vm2, %v1219_v2, %v1206_v41 }
 0x356   :  { %2833 = vmatprep.subr.bf16.mxu1 %v3354_v7  ;;  %v1218_v7 = vsel %vm225_vm1, %v1214_v0, %v3021_v58 }
 0x359   :  { %2835 = vmatpush1.bf16.msra.mxu1 %v3363_v10  ;;  %v1222_v10 = vsel %vm230_vm2, %v1218_v7, %v1204_v39 }
 0x35a   :  { %2865 = vmatprep.subr.bf16.mxu1 %v3547_v15  ;;  %v2365_v15 = vld [vmem:[%s4405_s0 + $0x34] sm:$0xff] }
 0x35c   :  { %1302 = vmatmul.mubr.f32.vlgmr.msra.gmra.mrb[12].mxu1 %v1221_v36 }
 0x35d   :  { %2368 = vmatprep.mubr.msk.f32.mxu1 %vm220_vm0, %v2364_v6  ;;  %2867 = vmatpush3.bf16.msra.mxu1 %v3558_v27  ;;  %v1220_v27 = vsel %vm225_vm1, %v1216_v14, %v1192_v63  ;;  %vm4447_vm1 = vcmask 564224  }
 0x35e   :  { %2869 = vmatprep.subr.bf16.mxu1 %v3560_v28  ;;  %v1224_v28 = vsel %vm230_vm2, %v1220_v27, %v1208_v20  ;;  %vm4489_vm2 = vcmask 1045509  }
 0x360   :  { %1308 = vmatmul.mubr.f32.gmra.mrb[14].mxu1 %v1222_v10 }
 0x361   :  { %2369 = vmatprep.mubr.msk.f32.mxu1 %vm220_vm0, %v2365_v15  ;;  %2871 = vmatpush3.bf16.msra.mxu1 %v3576_v42  ;;  %v4470_v42 = vld [vmem:[#allocation20_spill] sm:$0xff] }
 0x362   :  { %2873 = vmatprep.subr.bf16.mxu1 %v3579_v45  ;;  %v4471_v45 = vld [vmem:[#allocation21_spill] sm:$0xff] }
 0x364   :  { %1314 = vmatmul.mubr.f32.gmra.mrb[16].mxu1 %v1223_v21 }
 0x365   :  { %2370 = vmatprep.mubr.msk.f32.mxu1 %vm220_vm0, %v2366_v26  ;;  %2875 = vmatpush3.bf16.msra.mxu1 %v3602_v4  ;;  %v143_v4 = vld [vmem:[%s4411_s6] sm:$0xff]  ;;  %vm976_vm0 = vcmask 1044480  }
 0x366   :  { %2877 = vmatprep.subr.bf16.mxu1 %v3611_v54  ;;  %v144_v54 = vld [vmem:[%s4411_s6 + $0x8] sm:$0xff] }
 0x368   :  { %1320 = vmatmul.mubr.f32.gmra.mrb[18].mxu1 %v1224_v28 }
 0x369   :  { %2879 = vmatpush3.bf16.msra.mxu1 %v3639_v25  ;;  %v145_v25 = vld [vmem:[%s4411_s6 + $0x10] sm:$0xff] }
 0x36a   :  { %2881 = vmatprep.subr.bf16.mxu1 %v3642_v30  ;;  %v4017_v30 = vpack.c.bf16 %v144_v54, %v143_v4  ;;  %v4475_v4 = vld [vmem:[#allocation5_spill] sm:$0xff]  ;;  %v4476_v54 = vld [vmem:[#allocation6_spill] sm:$0xff] }
 0x36c   :  { %2781 = vmatprep.subr.bf16.mxu0 %v4017_v30 }
 0x36d   :  { %2883 = vmatpush3.bf16.msra.mxu1 %v3659_v49  ;;  %v146_v49 = vld [vmem:[%s4411_s6 + $0x18] sm:$0xff]  ;;  %2783 = vmatpush3.bf16.msra.mxu0 %v4017_v30 }
 0x36e   :  { %2885 = vmatprep.subr.bf16.mxu1 %v3662_v50  ;;  %v4022_v50 = vpack.c.bf16 %v146_v49, %v145_v25  ;;  %v4477_v25 = vld [vmem:[#allocation7_spill] sm:$0xff]  ;;  %v4478_v49 = vld [vmem:[#allocation8_spill] sm:$0xff] }
 0x370   :  { %2785 = vmatprep.subr.bf16.mxu0 %v4022_v50 }
 0x371   :  { %2887 = vmatpush3.bf16.msra.mxu1 %v4470_v42  ;;  %2787 = vmatpush3.bf16.msra.mxu0 %v4022_v50 }
 0x372   :  { %2889 = vmatprep.subr.bf16.mxu1 %v4471_v45 }
 0x375   :  { %2891 = vmatpush3.bf16.msra.mxu1 %v3803_v56  ;;  %v147_v56 = vld [vmem:[%s4411_s6 + $0x20] sm:$0xff] }
 0x376   :  { %2893 = vmatprep.subr.bf16.mxu1 %v3805_v22  ;;  %v148_v22 = vld [vmem:[%s4411_s6 + $0x28] sm:$0xff] }
 0x379   :  { %2895 = vmatpush3.bf16.msra.mxu1 %v3826_v18  ;;  %v4034_v18 = vpack.c.bf16 %v148_v22, %v147_v56  ;;  %v4479_v56 = vld [vmem:[#allocation9_spill] sm:$0xff]  ;;  %v4480_v22 = vld [vmem:[#allocation10_spill] sm:$0xff] }
 0x37a   :  { %2923 = vmatprep.subr.bf16.mxu1 %v4017_v30 }
 0x37b   :  { %2789 = vmatprep.subr.bf16.mxu0 %v4034_v18 }
 0x37c   :  { %2791 = vmatpush3.bf16.msra.mxu0 %v4034_v18 }
 0x37d   :  { %2793 = vmatprep.subr.bf16.mxu0 %v4044_v8 }
 0x380   :  { %2795 = vmatpush3.bf16.msra.mxu0 %v4044_v8 }
 0x381   :  { %2584 = vmatprep.subr.msk.mxu0 %vm976_vm0, %v4052_v43 }
 0x384   :  { %2585 = vmatpush3.msk.msra.mxu0 %vm976_vm0, %v4052_v43 }
 0x385   :  { %2836 = vmatprep.subr.bf16.mxu0 %v4472_v37 }
 0x407   :  { %v2439_v35 = vpop.f32.mrb[8].mxu1 }
 0x408   :  { %v2440_v9 = vpop.f32.mrb[9].mxu1 }
 0x409   :  { %v2441_v61 = vadd.f32 %v2440_v9, %v2439_v35  ;;  %v4482_v9 = vld [vmem:[#allocation12_spill] sm:$0xff] }
 0x40b   :  { %v2442_v3 = vpop.f32.mrb[10].mxu1  ;;  %v874_v57 = vadd.f32 %v2441_v61, %v4062_v29 }
 0x40c   :  { %v2443_v12 = vpop.f32.mrb[11].mxu1 }
 0x40d   :  { %v2444_v60 = vadd.f32 %v2443_v12, %v2442_v3 }
 0x40e   :  { %v2567_v33 = vpop.f32.mrb[8].mxu0 }
 0x40f   :  { %v879_v16 = vadd.f32 %v2444_v60, %v4062_v29  ;;  %v948_v17 = vpop.f32.mrb[9].mxu0 }
 0x410   :  { %v949_v23 = vadd.f32 %v948_v17, %v874_v57 }
 0x411   :  { %v954_v24 = vadd.f32 %v2567_v33, %v879_v16  ;;  %v4483_v33 = vld [vmem:[#allocation13_spill] sm:$0xff] }
 0x412   :  { %v957_v31 = vmax.f32 %v949_v23, 0.0  ;;  %v4485_v23 = vld [vmem:[#allocation17_spill] sm:$0xff] }
 0x413   :  { %v958_v32 = vmax.f32 %v954_v24, 0.0 }
 0x414   :  { %961 = vrot.lane.b32.xlu1 %v957_v31, %s3066_s2 }
 0x415   :  { %963 = vrot.lane.b32.xlu0 %v958_v32, %s3066_s2 }
 0x42f   :  { %v1303_v39 = vpop.f32.mrb[12].mxu1 }
 0x430   :  { %v4069_v46 = vadd.f32 %v1303_v39, %v4473_v40  ;;  %v1305_v47 = vpop.f32.mrb[13].mxu1 }
 0x431   :  { %v1306_v53 = vadd.f32 %v1305_v47, %v4474_v52 }
 0x432   :  { %v1326_v58 = vmax.f32 %v4069_v46, 0.0  ;;  %v4486_v46 = vld [vmem:[#allocation18_spill] sm:$0xff] }
 0x433   :  { %v1327_v59 = vmax.f32 %v1306_v53, 0.0  ;;  %v1309_v44 = vpop.f32.mrb[14].mxu1 }
 0x434   :  { %v4074_v0 = vadd.f32 %v1309_v44, %v4473_v40  ;;  %v1311_v1 = vpop.f32.mrb[15].mxu1  ;;  %1342 = vrot.lane.b32.xlu1 %v1326_v58, %s3066_s2  ;;  %v4487_v44 = vld [vmem:[#allocation19_spill] sm:$0xff] }
 0x435   :  { %v1312_v36 = vadd.f32 %v1311_v1, %v4474_v52  ;;  %1344 = vrot.lane.b32.xlu0 %v1327_v59, %s3066_s2 }
 0x436   :  { %v1328_v41 = vmax.f32 %v4074_v0, 0.0 }
 0x437   :  { %v1329_v6 = vmax.f32 %v1312_v36, 0.0  ;;  %v1315_v7 = vpop.f32.mrb[16].mxu1 }
 0x438   :  { %v4081_v19 = vadd.f32 %v1315_v7, %v4473_v40  ;;  %v1317_v13 = vpop.f32.mrb[17].mxu1  ;;  %1346 = vrot.lane.b32.xlu1 %v1328_v41, %s3066_s2  ;;  %v4488_v7 = vld [vmem:[#allocation22_spill] sm:$0xff] }
 0x439   :  { %v1318_v5 = vadd.f32 %v1317_v13, %v4474_v52  ;;  %1348 = vrot.lane.b32.xlu0 %v1329_v6, %s3066_s2 }
 0x43a   :  { %v1330_v10 = vmax.f32 %v4081_v19, 0.0 }
 0x43b   :  { %v1331_v2 = vmax.f32 %v1318_v5, 0.0  ;;  %v1321_v15 = vpop.f32.mrb[18].mxu1 }
 0x43c   :  { %v4088_v14 = vadd.f32 %v1321_v15, %v4473_v40  ;;  %v1323_v63 = vpop.f32.mrb[19].mxu1  ;;  %1350 = vrot.lane.b32.xlu1 %v1330_v10, %s3066_s2 }
 0x43d   :  { %v1324_v21 = vadd.f32 %v1323_v63, %v4474_v52  ;;  %1352 = vrot.lane.b32.xlu0 %v1331_v2, %s3066_s2 }
 0x43e   :  { %v1332_v27 = vmax.f32 %v4088_v14, 0.0 }
 0x43f   :  { %v1333_v20 = vmax.f32 %v1324_v21, 0.0 }
 0x440   :  { %1354 = vrot.lane.b32.xlu1 %v1332_v27, %s3066_s2 }
 0x441   :  { %1356 = vrot.lane.b32.xlu0 %v1333_v20, %s3066_s2 }
 0x486   :  { %v962_v26 = vpop.permute.xlu1 %961 }
 0x487   :  { %v967_v28 = vmax.f32 %v957_v31, %v962_v26  ;;  %v964_v42 = vpop.permute.xlu0 %963 }
 0x488   :  { %v968_v45 = vmax.f32 %v958_v32, %v964_v42 }
 0x489   :  { %2586 = vmatprep.mubr.msk.f32.mxu0 %vm4447_vm1, %v967_v28 }
 0x48a   :  { %2587 = vmatmul.mubr.msk.f32.vlgmr.msra.gmra.mrb[10].mxu0 %vm4447_vm1, %v968_v45 }
 0x48b   :  { %2838 = vmatpush1.bf16.msra.mxu0 %v4475_v4 }
 0x48c   :  { %2839 = vmatprep.subr.bf16.mxu0 %v4472_v37 }
 0x48f   :  { %2841 = vmatpush1.bf16.msra.mxu0 %v4476_v54 }
 0x490   :  { %2842 = vmatprep.subr.bf16.mxu0 %v4472_v37 }
 0x493   :  { %2844 = vmatpush1.bf16.msra.mxu0 %v4477_v25 }
 0x494   :  { %2845 = vmatprep.subr.bf16.mxu0 %v4472_v37 }
 0x497   :  { %2847 = vmatpush1.bf16.msra.mxu0 %v4478_v49 }
 0x498   :  { %2848 = vmatprep.subr.bf16.mxu0 %v4472_v37 }
 0x49b   :  { %2850 = vmatpush1.bf16.msra.mxu0 %v4479_v56 }
 0x49c   :  { %2851 = vmatprep.subr.bf16.mxu0 %v4472_v37 }
 0x49f   :  { %2853 = vmatpush1.bf16.msra.mxu0 %v4480_v22 }
 0x4a0   :  { %2854 = vmatprep.subr.bf16.mxu0 %v4472_v37 }
 0x4a3   :  { %2856 = vmatpush1.bf16.msra.mxu0 %v4481_v34 }
 0x4a4   :  { %2857 = vmatprep.subr.bf16.mxu0 %v4472_v37 }
 0x4a6   :  { %v1343_v62 = vpop.permute.xlu1 %1342 }
 0x4a7   :  { %v1345_v35 = vpop.permute.xlu0 %1344  ;;  %2859 = vmatpush1.bf16.msra.mxu0 %v4482_v9 }
 0x4a8   :  { %v1371_v61 = vmax.f32 %v1327_v59, %v1345_v35  ;;  %2860 = vmatprep.subr.bf16.mxu0 %v4472_v37  ;;  %v1358_v3 = vsel %vm379_vm6, %v1343_v62, %v1345_v35 }
 0x4a9   :  { %v1370_v16 = vmax.f32 %v1326_v58, %v1358_v3 }
 0x4aa   :  { %2372 = vmatprep.mubr.msk.f32.mxu0 %vm400_vm7, %v1371_v61  ;;  %v1347_v12 = vpop.permute.xlu1 %1346 }
 0x4ab   :  { %v1349_v60 = vpop.permute.xlu0 %1348  ;;  %2863 = vmatpush1.bf16.msk.msra.mxu0 %vm3495_vm5, %v4483_v33  ;;  %vm4490_vm5 = vmmov %vm4489_vm2 }
 0x4ac   :  { %v1373_v17 = vmax.f32 %v1329_v6, %v1349_v60  ;;  %2897 = vmatprep.subr.bf16.mxu0 %v4485_v23  ;;  %v1359_v24 = vsel %vm379_vm6, %v1347_v12, %v1349_v60 }
 0x4ad   :  { %v1372_v39 = vmax.f32 %v1328_v41, %v1359_v24 }
 0x4ae   :  { %1455 = vmatmul.mubr.f32.vlgmr.msra.gmra.mrb[12].mxu0 %v1370_v16  ;;  %v1351_v31 = vpop.permute.xlu1 %1350 }
 0x4af   :  { %v1353_v32 = vpop.permute.xlu0 %1352  ;;  %2373 = vmatprep.mubr.msk.f32.mxu0 %vm400_vm7, %v1373_v17  ;;  %2899 = vmatpush3.bf16.msra.mxu0 %v4485_v23 }
 0x4b0   :  { %v1375_v40 = vmax.f32 %v1331_v2, %v1353_v32  ;;  %2901 = vmatprep.subr.bf16.mxu0 %v4486_v46  ;;  %v1360_v47 = vsel %vm379_vm6, %v1351_v31, %v1353_v32 }
 0x4b1   :  { %v1374_v58 = vmax.f32 %v1330_v10, %v1360_v47 }
 0x4b2   :  { %1460 = vmatmul.mubr.f32.gmra.mrb[14].mxu0 %v1372_v39  ;;  %v1355_v52 = vpop.permute.xlu1 %1354 }
 0x4b3   :  { %v1357_v53 = vpop.permute.xlu0 %1356  ;;  %2374 = vmatprep.mubr.msk.f32.mxu0 %vm400_vm7, %v1375_v40  ;;  %2903 = vmatpush3.bf16.msra.mxu0 %v4486_v46 }
 0x4b4   :  { %v1377_v59 = vmax.f32 %v1333_v20, %v1357_v53  ;;  %2905 = vmatprep.subr.bf16.mxu0 %v4487_v44  ;;  %v1361_v0 = vsel %vm379_vm6, %v1355_v52, %v1357_v53  ;;  %vm4491_vm6 = vcmask 1046534  }
 0x4b5   :  { %v1376_v1 = vmax.f32 %v1332_v27, %v1361_v0 }
 0x4b6   :  { %1465 = vmatmul.mubr.f32.gmra.mrb[16].mxu0 %v1374_v58 }
 0x4b7   :  { %2375 = vmatprep.mubr.msk.f32.mxu0 %vm400_vm7, %v1377_v59  ;;  %2907 = vmatpush3.bf16.msra.mxu0 %v4487_v44  ;;  %vm4492_vm7 = vmmov %vm4491_vm6 }
 0x4b8   :  { %2909 = vmatprep.subr.bf16.mxu0 %v3824_v48 }
 0x4ba   :  { %1470 = vmatmul.mubr.f32.gmra.mrb[18].mxu0 %v1376_v1 }
 0x4bb   :  { %2911 = vmatpush3.bf16.msra.mxu0 %v3824_v48 }
 0x4bc   :  { %2913 = vmatprep.subr.bf16.mxu0 %v3833_v55 }
 0x4bf   :  { %2915 = vmatpush3.bf16.msra.mxu0 %v3833_v55 }
 0x4c0   :  { %2918 = vmatprep.subr.msk.bf16.mxu0 %vm3866_vm3, %v3858_v11 }
 0x4c3   :  { %2921 = vmatpush3.bf16.msk.msra.mxu0 %vm3866_vm3, %v3858_v11  ;;  %vm4493_vm3 = vcmask 1047559  }
 0x4c4   :  { %2938 = vmatprep.subr.bf16.mxu0 %v4472_v37  ;;  %vm4494_vm1 = vmmov %vm4493_vm3 }
 0x55d   :  { %v4142_v36 = vpop.f32.mrb[10].mxu0 }
 0x55e   :  { %v4144_v41 = vpop.f32.mrb[11].mxu0 }
 0x581   :  { %v1456_v6 = vpop.f32.mrb[12].mxu0 }
 0x582   :  { %v1479_v48 = vcombine.high %v1456_v6, %v1456_v6  ;;  %v1486_v19 = vrot.slane %v1456_v6, %v4488_v7  ;;  %v1458_v13 = vpop.f32.mrb[13].mxu0 }
 0x584   :  { %v1493_v55 = vrot.slane %v1479_v48, %v4488_v7  ;;  %v1494_v5 = vcombine.high %v1486_v19, %v1486_v19  ;;  %v2376_v10 = vrot.slane %v1486_v19, 9 }
 0x585   :  { %v1461_v2 = vpop.f32.mrb[14].mxu0 }
 0x586   :  { %v1495_v15 = vcombine.high %v1493_v55, %v1493_v55  ;;  %v2377_v14 = vrot.slane %v1494_v5, 9  ;;  %v2378_v51 = vrot.slane %v1493_v55, 9  ;;  %v1594_v11 = vmax.f32 %v1486_v19, %v2376_v10  ;;  %v1463_v63 = vpop.f32.mrb[15].mxu0 }
 0x587   :  { %v1496_v21 = vcombine.high %v1461_v2, %v1461_v2  ;;  %v1503_v27 = vrot.slane %v1461_v2, %v4488_v7 }
 0x588   :  { %v2379_v20 = vrot.slane %v1495_v15, 9  ;;  %v1595_v26 = vmax.f32 %v1494_v5, %v2377_v14  ;;  %v1596_v28 = vmax.f32 %v1493_v55, %v2378_v51  ;;  %v1621_v42 = vrot.slane %v1594_v11, %v3500_v38 }
 0x589   :  { %v1510_v45 = vrot.slane %v1496_v21, %v4488_v7  ;;  %v1511_v4 = vcombine.high %v1503_v27, %v1503_v27  ;;  %v2380_v54 = vrot.slane %v1503_v27, 9  ;;  %v1466_v25 = vpop.f32.mrb[16].mxu0 }
 0x58a   :  { %v1597_v49 = vmax.f32 %v1495_v15, %v2379_v20  ;;  %v1625_v56 = vrot.slane %v1595_v26, %v3500_v38  ;;  %v1629_v22 = vrot.slane %v1596_v28, %v3500_v38  ;;  %v1513_v34 = vcombine.high %v1466_v25, %v1466_v25  ;;  %v1468_v62 = vpop.f32.mrb[17].mxu0 }
 0x58b   :  { %v1512_v35 = vcombine.high %v1510_v45, %v1510_v45  ;;  %v2381_v9 = vrot.slane %v1511_v4, 9  ;;  %v2382_v61 = vrot.slane %v1510_v45, 9  ;;  %v1598_v3 = vmax.f32 %v1503_v27, %v2380_v54 }
 0x58c   :  { %v4154_v12 = vrot.slane %v1597_v49, %v3500_v38  ;;  %v1658_v60 = vsel %vm685_vm8, %v1625_v56, %v1621_v42  ;;  %v1673_v33 = vsel %vm685_vm8, %v1629_v22, %v1625_v56  ;;  %v1520_v57 = vrot.slane %v1466_v25, %v4488_v7 }
 0x58d   :  { %v1659_v16 = vsel %vm687_vm9, %v1629_v22, %v1658_v60  ;;  %v2383_v17 = vrot.slane %v1512_v35, 9  ;;  %v1599_v23 = vmax.f32 %v1511_v4, %v2381_v9  ;;  %v1600_v24 = vmax.f32 %v1510_v45, %v2382_v61  ;;  %v1471_v31 = vpop.f32.mrb[18].mxu0 }
 0x58e   :  { %v1692_v32 = vsel %vm685_vm8, %v4154_v12, %v1629_v22  ;;  %v1637_v39 = vrot.slane %v1598_v3, %v3500_v38  ;;  %v1527_v40 = vrot.slane %v1513_v34, %v4488_v7  ;;  %v1528_v46 = vcombine.high %v1520_v57, %v1520_v57  ;;  %v1473_v47 = vpop.f32.mrb[19].mxu0 }
 0x58f   :  { %v1601_v52 = vmax.f32 %v1512_v35, %v2383_v17  ;;  %v1641_v53 = vrot.slane %v1599_v23, %v3500_v38  ;;  %v2384_v58 = vrot.slane %v1520_v57, 9  ;;  %v1536_v1 = vrot.slane %v1471_v31, %v4488_v7 }
 0x590   :  { %v1529_v59 = vcombine.high %v1527_v40, %v1527_v40  ;;  %v2385_v44 = vrot.slane %v1528_v46, 9  ;;  %v2386_v0 = vrot.slane %v1527_v40, 9  ;;  %v1645_v6 = vrot.slane %v1600_v24, %v3500_v38 }
 0x591   :  { %v1602_v48 = vmax.f32 %v1520_v57, %v2384_v58  ;;  %v1693_v19 = vsel %vm687_vm9, %v1637_v39, %v1692_v32  ;;  %v1674_v13 = vsel %vm687_vm9, %v4154_v12, %v1673_v33  ;;  %v1649_v55 = vrot.slane %v1601_v52, %v3500_v38 }
 0x592   :  { %v1603_v5 = vmax.f32 %v1528_v46, %v2385_v44  ;;  %v1604_v10 = vmax.f32 %v1527_v40, %v2386_v0  ;;  %v2388_v2 = vrot.slane %v1536_v1, 9  ;;  %v1694_v14 = vsel %vm689_vm10, %v1641_v53, %v1693_v19 }
 0x593   :  { %v1653_v15 = vrot.slane %v1602_v48, %v3500_v38  ;;  %v1675_v51 = vsel %vm689_vm10, %v1637_v39, %v1674_v13  ;;  %v2387_v11 = vrot.slane %v1529_v59, 9  ;;  %v1537_v27 = vcombine.high %v1536_v1, %v1536_v1 }
 0x594   :  { %v1657_v63 = vrot.slane %v1603_v5, %v3500_v38  ;;  %v1672_v21 = vrot.slane %v1604_v10, %v3500_v38  ;;  %v1695_v20 = vsel %vm691_vm11, %v1645_v6, %v1694_v14  ;;  %v1676_v26 = vsel %vm691_vm11, %v1641_v53, %v1675_v51 }
 0x595   :  { %v1605_v28 = vmax.f32 %v1529_v59, %v2387_v11  ;;  %v1711_v42 = vsel %vm685_vm8, %v1637_v39, %v4154_v12  ;;  %v1606_v45 = vmax.f32 %v1536_v1, %v2388_v2  ;;  %v1696_v4 = vsel %vm4489_vm2, %v1649_v55, %v1695_v20 }
 0x596   :  { %v1677_v54 = vsel %vm4490_vm5, %v1645_v6, %v1676_v26  ;;  %v1680_v25 = vsel %vm685_vm8, %v1672_v21, %v1657_v63  ;;  %v1697_v49 = vsel %vm4491_vm6, %v1653_v15, %v1696_v4  ;;  %v1712_v34 = vsel %vm687_vm9, %v1641_v53, %v1711_v42  ;;  %vm4497_vm5 = vmmov %vm4489_vm2 }
 0x597   :  { %v1678_v56 = vsel %vm4492_vm7, %v1649_v55, %v1677_v54  ;;  %v1691_v22 = vrot.slane %v1605_v28, %v3500_v38  ;;  %v1698_v62 = vsel %vm4493_vm3, %v1657_v63, %v1697_v49  ;;  %v1713_v9 = vsel %vm689_vm10, %v1645_v6, %v1712_v34  ;;  %vm4499_vm7 = vmmov %vm4493_vm3 }
 0x598   :  { %v1679_v35 = vsel %vm4494_vm1, %v1653_v15, %v1678_v56  ;;  %v1730_v61 = vsel %vm685_vm8, %v1641_v53, %v1637_v39  ;;  %1700 = vrot.lane.b32.xlu0 %v1698_v62, %s3068_s5  ;;  %v1714_v60 = vsel %vm691_vm11, %v1649_v55, %v1713_v9  ;;  %v2389_v57 = vrot.slane %v1537_v27, 9  ;;  %vm4495_vm1 = vmmov %vm4491_vm6 }
 0x599   :  { %v3022_v3 = vpack.i.bf16 %v1680_v25, %v1679_v35  ;;  %v1731_v33 = vsel %vm687_vm9, %v1645_v6, %v1730_v61  ;;  %v1715_v17 = vsel %vm4489_vm2, %v1653_v15, %v1714_v60  ;;  %v1710_v24 = vrot.slane %v1606_v45, %v3500_v38  ;;  %vm4496_vm9 = vmmov %vm4493_vm3  ;;  %v2098_v60 = vld [vmem:[%s4412_s7 + $0x8] sm:$0xff] }
 0x59a   :  { %v1732_v23 = vsel %vm689_vm10, %v1649_v55, %v1731_v33  ;;  %v1716_v31 = vsel %vm4495_vm1, %v1657_v63, %v1715_v17  ;;  %v1660_v40 = vsel %vm689_vm10, %v4154_v12, %v1659_v16  ;;  %v1665_v46 = vsel %vm685_vm8, %v1657_v63, %v1653_v15  ;;  %vm4498_vm6 = vmmov %vm4495_vm1  ;;  %v2099_v33 = vld [vmem:[%s4412_s7 + $0x10] sm:$0xff]  ;;  %v2100_v17 = vld [vmem:[%s4412_s7 + $0x18] sm:$0xff] }
 0x59b   :  { %3023 = vrot.lane.b32.xlu1 %v3022_v3, %s3069_s18  ;;  %v1733_v32 = vsel %vm691_vm11, %v1653_v15, %v1732_v23  ;;  %v1699_v47 = vsel %vm685_vm8, %v1691_v22, %v1672_v21  ;;  %v1717_v52 = vsel %vm4496_vm9, %v1672_v21, %v1716_v31  ;;  %v1718_v59 = vsel %vm685_vm8, %v1710_v24, %v1691_v22  ;;  %vm4500_vm10 = vmmov %vm4489_vm2  ;;  %v2102_v31 = vld [vmem:[%s4412_s7 + $0x28] sm:$0xff] }
 0x59c   :  { %v1734_v58 = vsel %vm4497_vm5, %v1657_v63, %v1733_v32  ;;  %1702 = vrot.lane.b32.xlu0 %v1699_v47, %s3068_s5  ;;  %v1661_v0 = vsel %vm691_vm11, %v1637_v39, %v1660_v40  ;;  %v1607_v1 = vmax.f32 %v1537_v27, %v2389_v57  ;;  %vm4501_vm3 = vmmov %vm4495_vm1  ;;  %v2942_v23 = vpack.c.bf16 %v2100_v17, %v2099_v33  ;;  %v2103_v40 = vld [vmem:[%s4412_s7 + $0x30] sm:$0xff] }
 0x59d   :  { %v1735_v44 = vsel %vm4498_vm6, %v1672_v21, %v1734_v58  ;;  %v1662_v12 = vsel %vm4500_vm10, %v1641_v53, %v1661_v0  ;;  %vm4502_vm2 = vmmov %vm4499_vm7  ;;  %v2106_v58 = vld [vmem:[%s4412_s7 + $0x48] sm:$0xff]  ;;  %v2108_v0 = vld [vmem:[%s4412_s7 + $0x58] sm:$0xff]  ;;  %vm2130_vm11 = vcmask 1046528   ;;  %vm1141_vm1 = vcmask 859136  }
 0x59e   :  { %v1736_v48 = vsel %vm4499_vm7, %v1691_v22, %v1735_v44  ;;  %v1663_v16 = vsel %vm4501_vm3, %v1645_v6, %v1662_v12  ;;  %v1729_v13 = vrot.slane %v1607_v1, %v3500_v38  ;;  %v2107_v44 = vld [vmem:[%s4412_s7 + $0x50] sm:$0xff]  ;;  %v2110_v12 = vld [vmem:[%s4412_s7 + $0x68] sm:$0xff]  ;;  %vm2094_vm9 = vcmask 1040384  }
 0x59f   :  { %1719 = vrot.lane.b32.xlu1 %v1717_v52, %s3070_s13  ;;  %v1664_v19 = vsel %vm4502_vm2, %v1649_v55, %v1663_v16  ;;  %v2105_v52 = vld [vmem:[%s4412_s7 + $0x40] sm:$0xff]  ;;  %v2954_v1 = vpack.c.bf16 %v2108_v0, %v2107_v44  ;;  %vm2126_vm5 = vcmask 384000   ;;  %vm2219_vm6 = vcmask 408576  }
 0x5a0   :  { %1738 = vrot.lane.b32.xlu0 %v1736_v48, %s3071_s3  ;;  %v1737_v5 = vsel %vm685_vm8, %v1729_v13, %v1710_v24  ;;  %v2101_v24 = vld [vmem:[%s4412_s7 + $0x20] sm:$0xff]  ;;  %v1057_v13 = vcombine.high %v4144_v41, %v4144_v41 }
 0x5a1   :  { %v2945_v32 = vpack.c.bf16 %v2102_v31, %v2101_v24  ;;  %v2109_v48 = vld [vmem:[%s4412_s7 + $0x60] sm:$0xff] }
 0x5a2   :  { %v2957_v16 = vpack.c.bf16 %v2110_v12, %v2109_v48  ;;  %v2205_v31 = vld [vmem:[%s4414_s9] sm:$0xff] }
 0x5a3   :  { %1721 = vrot.lane.b32.xlu1 %v1718_v59, %s3070_s13  ;;  %v2951_v59 = vpack.c.bf16 %v2106_v58, %v2105_v52 }
 0x5a7   :  { %1740 = vrot.lane.b32.xlu1 %v1737_v5, %s3071_s3  ;;  %v2111_v5 = vld [vmem:[%s4412_s7 + $0x70] sm:$0xff]  ;;  %s3072_s3 = smov 35  }
 0x60a   :  { %v1701_v39 = vpop.permute.xlu0 %1700 }
 0x60d   :  { %v3024_v10 = vpop.permute.xlu1 %3023 }
 0x60e   :  { %v3025_v2 = vunpack.i.l.bf16 %v3024_v10  ;;  %v1703_v53 = vpop.permute.xlu0 %1702  ;;  %v3026_v14 = vunpack.i.h.bf16 %v3024_v10 }
 0x610   :  { %v1746_v15 = vsel %vm781_vm15, %v3025_v2, %v1701_v39  ;;  %v1744_v11 = vsel %vm778_vm14, %v1664_v19, %v3025_v2  ;;  %v1747_v21 = vsel %vm781_vm15, %v3026_v14, %v1703_v53  ;;  %v1745_v26 = vsel %vm778_vm14, %v1665_v46, %v3026_v14  ;;  %v2104_v46 = vld [vmem:[%s4412_s7 + $0x38] sm:$0xff] }
 0x611   :  { %v1720_v6 = vpop.permute.xlu1 %1719  ;;  %v2948_v47 = vpack.c.bf16 %v2104_v46, %v2103_v40  ;;  %v4299_v19 = vrot.slane %v4144_v41, %v4488_v7  ;;  %v2112_v39 = vld [vmem:[%s4412_s7 + $0x78] sm:$0xff]  ;;  %v1071_v53 = vrot.slane %v1057_v13, %v4488_v7  ;;  %v2207_v40 = vld [vmem:[%s4414_s9 + $0x10] sm:$0xff] }
 0x612   :  { %v1748_v55 = vsel %vm784_vm4, %v1746_v15, %v1720_v6  ;;  %v1739_v51 = vpop.permute.xlu0 %1738  ;;  %v2960_v10 = vpack.c.bf16 %v2112_v39, %v2111_v5 }
 0x613   :  { %1822 = vmatprep.mubr.f32.mxu1 %v1748_v55  ;;  %v1750_v63 = vsel %vm787_vm13, %v1720_v6, %v1739_v51  ;;  %v1072_v2 = vcombine.high %v4299_v19, %v4299_v19  ;;  %v2113_v55 = vld [vmem:[%s4412_s7 + $0x80] sm:$0xff]  ;;  %v2114_v51 = vld [vmem:[%s4412_s7 + $0x88] sm:$0xff]  ;;  %v2342_v12 = vrot.slane %v4299_v19, 9 }
 0x614   :  { %1823 = vmatmul.mubr.f32.vlgmr.msra.gmra.mrb[20].mxu1 %v1744_v11  ;;  %2613 = vmatprep.mubr.msk.f32.mxu0 %vm796_vm12, %v1750_v63  ;;  %v2344_v11 = vrot.slane %v1071_v53, 9 }
 0x615   :  { %v1722_v27 = vpop.permute.xlu1 %1721  ;;  %2925 = vmatpush3.bf16.msra.mxu1 %v4017_v30  ;;  %v2343_v14 = vrot.slane %v1072_v2, 9 }
 0x616   :  { %v1749_v20 = vsel %vm784_vm4, %v1747_v21, %v1722_v27  ;;  %2927 = vmatprep.subr.bf16.mxu1 %v4022_v50  ;;  %vm4503_vm4 = vcmask 564224  }
 0x617   :  { %1827 = vmatprep.mubr.f32.mxu1 %v1749_v20  ;;  %vm4504_vm8 = vmmov %vm4503_vm4  ;;  %v1080_v20 = vrot.slane %v4142_v36, %v4488_v7  ;;  %v2116_v36 = vld [vmem:[%s4412_s7 + $0x98] sm:$0xff] }
 0x618   :  { %1828 = vmatmul.mubr.f32.gmra.mrb[22].mxu1 %v1745_v26 }
 0x619   :  { %v1741_v28 = vpop.permute.xlu1 %1740  ;;  %2929 = vmatpush3.bf16.msra.mxu1 %v4022_v50 }
 0x61a   :  { %v1751_v42 = vsel %vm787_vm13, %v1722_v27, %v1741_v28  ;;  %2931 = vmatprep.subr.bf16.mxu1 %v4034_v18  ;;  %v2963_v27 = vpack.c.bf16 %v2114_v51, %v2113_v55 }
 0x61b   :  { %2614 = vmatmul.mubr.msk.f32.vlgmr.msra.gmra.mrb[20].mxu0 %vm796_vm12, %v1751_v42  ;;  %vm4505_vm12 = vmmov 1  }
 0x61c   :  { %vm2970_vm13 = vmpackc.low %vm2130_vm11, %vm4505_vm12 }
 0x61d   :  { %2933 = vmatpush3.bf16.msra.mxu1 %v4034_v18 }
 0x61e   :  { %2935 = vmatprep.subr.bf16.mxu1 %v4044_v8 }
 0x621   :  { %2937 = vmatpush3.bf16.msra.mxu1 %v4044_v8 }
 0x622   :  { %2632 = vmatprep.subr.msk.mxu1 %vm976_vm0, %v4052_v43 }
 0x625   :  { %2633 = vmatpush3.msk.msra.mxu1 %vm976_vm0, %v4052_v43  ;;  %vm1138_vm0 = vcmask 285696  }
 0x626   :  { %2972 = vmatprep.subr.bf16.mxu1 %v4472_v37 }
 0x6e7   :  { %v2502_v30 = vpop.f32.mrb[20].mxu1 }
 0x6e8   :  { %v2503_v50 = vpop.f32.mrb[21].mxu1 }
 0x6e9   :  { %v2504_v45 = vadd.f32 %v2503_v50, %v2502_v30  ;;  %v1102_v50 = vmax.f32 %v1072_v2, %v2343_v14 }
 0x6eb   :  { %v2505_v4 = vpop.f32.mrb[22].mxu1  ;;  %v1825_v18 = vadd.f32 %v2504_v45, %v4062_v29 }
 0x6ec   :  { %v2506_v54 = vpop.f32.mrb[23].mxu1 }
 0x6ed   :  { %v2507_v25 = vadd.f32 %v2506_v54, %v2505_v4  ;;  %v1103_v54 = vmax.f32 %v1071_v53, %v2344_v11 }
 0x6ee   :  { %v2615_v49 = vpop.f32.mrb[20].mxu0 }
 0x6ef   :  { %v1830_v56 = vadd.f32 %v2507_v25, %v4062_v29  ;;  %v1899_v8 = vpop.f32.mrb[21].mxu0  ;;  %v2097_v29 = vld [vmem:[%s4412_s7] sm:$0xff] }
 0x6f0   :  { %v1900_v22 = vadd.f32 %v1899_v8, %v1825_v18  ;;  %v2939_v57 = vpack.c.bf16 %v2098_v60, %v2097_v29 }
 0x6f1   :  { %v1905_v34 = vadd.f32 %v2615_v49, %v1830_v56  ;;  %v2115_v49 = vld [vmem:[%s4412_s7 + $0x90] sm:$0xff] }
 0x6f2   :  { %v1908_v62 = vmax.f32 %v1900_v22, 0.0  ;;  %2940 = vmatpush1.bf16.msra.mxu0 %v2939_v57  ;;  %v2966_v56 = vpack.c.bf16 %v2116_v36, %v2115_v49 }
 0x6f3   :  { %v1909_v35 = vmax.f32 %v1905_v34, 0.0  ;;  %2941 = vmatprep.subr.bf16.mxu0 %v4472_v37 }
 0x6f4   :  { %1912 = vrot.lane.b32.xlu0 %v1908_v62, %s3066_s2 }
 0x6f5   :  { %1914 = vrot.lane.b32.xlu1 %v1909_v35, %s3066_s2 }
 0x6f6   :  { %2943 = vmatpush1.bf16.msra.mxu0 %v2942_v23 }
 0x6f7   :  { %2944 = vmatprep.subr.bf16.mxu0 %v4472_v37 }
 0x6fa   :  { %2946 = vmatpush1.bf16.msra.mxu0 %v2945_v32  ;;  %v2206_v32 = vld [vmem:[%s4414_s9 + $0x8] sm:$0xff] }
 0x6fb   :  { %2947 = vmatprep.subr.bf16.mxu0 %v4472_v37  ;;  %v2973_v46 = vpack.c.bf16 %v2206_v32, %v2205_v31 }
 0x6fe   :  { %2949 = vmatpush1.bf16.msra.mxu0 %v2948_v47  ;;  %v2208_v47 = vld [vmem:[%s4414_s9 + $0x18] sm:$0xff] }
 0x6ff   :  { %2950 = vmatprep.subr.bf16.mxu0 %v4472_v37  ;;  %v2976_v52 = vpack.c.bf16 %v2208_v47, %v2207_v40 }
 0x702   :  { %2952 = vmatpush1.bf16.msra.mxu0 %v2951_v59 }
 0x703   :  { %2953 = vmatprep.subr.bf16.mxu0 %v4472_v37 }
 0x706   :  { %2955 = vmatpush1.bf16.msra.mxu0 %v2954_v1 }
 0x707   :  { %2956 = vmatprep.subr.bf16.mxu0 %v4472_v37 }
 0x70a   :  { %2958 = vmatpush1.bf16.msra.mxu0 %v2957_v16 }
 0x70b   :  { %2959 = vmatprep.subr.bf16.mxu0 %v4472_v37 }
 0x70e   :  { %2961 = vmatpush1.bf16.msra.mxu0 %v2960_v10 }
 0x70f   :  { %2962 = vmatprep.subr.bf16.mxu0 %v4472_v37 }
 0x712   :  { %2964 = vmatpush1.bf16.msra.mxu0 %v2963_v27 }
 0x713   :  { %2965 = vmatprep.subr.bf16.mxu0 %v4472_v37 }
 0x716   :  { %2967 = vmatpush1.bf16.msra.mxu0 %v2966_v56 }
 0x717   :  { %2968 = vmatprep.subr.bf16.mxu0 %v4472_v37 }
 0x766   :  { %v1913_v43 = vpop.permute.xlu0 %1912 }
 0x767   :  { %v1918_v9 = vmax.f32 %v1908_v62, %v1913_v43  ;;  %v1915_v61 = vpop.permute.xlu1 %1914  ;;  %v1073_v62 = vcombine.high %v1071_v53, %v1071_v53  ;;  %v2117_v43 = vld [vmem:[%s4412_s7 + $0xa0] sm:$0xff]  ;;  %v1101_v53 = vmax.f32 %v4299_v19, %v2342_v12 }
 0x768   :  { %v1919_v3 = vmax.f32 %v1909_v35, %v1915_v61  ;;  %v1110_v35 = vrot.slane %v1102_v50, %v3500_v38 }
 0x769   :  { %2634 = vmatprep.mubr.msk.f32.mxu1 %vm4503_vm4, %v1918_v9  ;;  %v2118_v9 = vld [vmem:[%s4412_s7 + $0xa8] sm:$0x7f]  ;;  %v2345_v24 = vrot.slane %v1073_v62, 9 }
 0x76a   :  { %2635 = vmatmul.mubr.msk.f32.vlgmr.msra.gmra.mrb[24].mxu1 %vm4504_vm8, %v1919_v3  ;;  %v1118_v3 = vrot.slane %v1103_v54, %v3500_v38  ;;  %v2969_v60 = vpack.c.bf16 %v2118_v9, %v2117_v43  ;;  %v2401_v54 = vld [vmem:[%s4413_s8] ss:$0 sm:$0xff] }
 0x76b   :  { %2974 = vmatpush3.bf16.msra.mxu1 %v2973_v46  ;;  %v1104_v44 = vmax.f32 %v1073_v62, %v2345_v24 }
 0x76c   :  { %2971 = vmatpush1.bf16.msk.msra.mxu0 %vm2970_vm13, %v2969_v60  ;;  %2975 = vmatprep.subr.bf16.mxu1 %v4472_v37 }
 0x76d   :  { %v1126_v0 = vrot.slane %v1104_v44, %v3500_v38 }
 0x76f   :  { %2977 = vmatpush3.bf16.msra.mxu1 %v2976_v52 }
 0x770   :  { %2978 = vmatprep.subr.bf16.mxu1 %v4472_v37 }
 0x83d   :  { %v2636_v15 = vpop.f32.mrb[24].mxu1 }
 0x83e   :  { %v2026_v41 = vrot.slane %v2636_v15, %v4488_v7  ;;  %v1992_v6 = vpop.f32.mrb[25].mxu1 }
 0x83f   :  { %v2003_v63 = vcombine.high %v1992_v6, %v1992_v6  ;;  %v4321_v21 = vrot.slane %v1992_v6, %v4488_v7 }
 0x840   :  { %v2400_v26 = vrot.slane %v2026_v41, 9 }
 0x841   :  { %v2017_v28 = vrot.slane %v2003_v63, %v4488_v7  ;;  %v2018_v42 = vcombine.high %v4321_v21, %v4321_v21  ;;  %v2346_v7 = vrot.slane %v1080_v20, 9  ;;  %v2396_v48 = vrot.slane %v4321_v21, 9 }
 0x842   :  { %v2051_v30 = vmax.f32 %v2026_v41, %v2400_v26 }
 0x843   :  { %v2397_v45 = vrot.slane %v2018_v42, 9  ;;  %v2398_v4 = vrot.slane %v2017_v28, 9  ;;  %v2019_v25 = vcombine.high %v2017_v28, %v2017_v28  ;;  %v1105_v33 = vmax.f32 %v1080_v20, %v2346_v7 }
 0x844   :  { %v2080_v18 = vrot.slane %v2051_v30, %v3500_v38  ;;  %v2047_v5 = vmax.f32 %v4321_v21, %v2396_v48  ;;  %v2210_v30 = vld [vmem:[%s4414_s9 + $0x28] sm:$0xff] }
 0x845   :  { %v2048_v8 = vmax.f32 %v2018_v42, %v2397_v45  ;;  %v2049_v22 = vmax.f32 %v2017_v28, %v2398_v4  ;;  %v2399_v34 = vrot.slane %v2019_v25, 9  ;;  %v1134_v58 = vrot.slane %v1105_v33, %v3500_v38  ;;  %v2209_v42 = vld [vmem:[%s4414_s9 + $0x20] sm:$0xff]  ;;  %v2211_v4 = vld [vmem:[%s4414_s9 + $0x30] sm:$0x3]  ;;  %s3037_s9 = scalar_lea.vmem %s2305_s26, 32 }
 0x846   :  { %2081 = vrot.lane.b32.xlu1 %v2080_v18, %s3068_s5  ;;  %v2979_v50 = vpack.c.bf16 %v2210_v30, %v2209_v42  ;;  %v3075_v45 = vmov 0.0   ;;  %v2404_v18 = vld [vmem:[%s4415_s10] ss:$0 sm:$0xff]  ;;  %p3038_p0 = scmp.ne.s32.totalorder %s2305_s26, %s3037_s9  ;;  %p3043_p2 = scmp.lt.s32.totalorder %s3037_s9, %s3037_s9 }
 0x847   :  { %v2056_v61 = vrot.slane %v2048_v8, %v3500_v38  ;;  %v2064_v29 = vrot.slane %v2049_v22, %v3500_v38  ;;  %v2050_v23 = vmax.f32 %v2019_v25, %v2399_v34 }
 0x848   :  { %2980 = vmatpush3.bf16.msra.mxu1 %v2979_v50  ;;  %p3044_p3 = por %p3043_p2, %p3042_p1 }
 0x849   :  { %v3027_v57 = vpack.i.bf16 %v1110_v35, %v2056_v61  ;;  %v3032_v17 = vpack.i.bf16 %v1118_v3, %v2064_v29  ;;  %v2072_v59 = vrot.slane %v2050_v23, %v3500_v38  ;;  %2649 = vmatprep.subr.mxu1 %v3075_v45 }
 0x84a   :  { %p3045_p4 = pnand %p3044_p3, %p3038_p0 }
 0x84b   :  { %3028 = vrot.lane.b32.xlu0 %v3027_v57, %s3072_s3  ;;  %3033 = vrot.lane.b32.xlu1 %v3032_v17, %s3069_s18 }
 0x84f   :  { %1135 = vrot.lane.b32.xlu1 %v1134_v58, %s3068_s5  ;;  %2073 = vrot.lane.b32.xlu0 %v2072_v59, %s3073_s19 }
 0x853   :  { %1127 = vrot.lane.b32.xlu0 %v1126_v0, %s3073_s19 }
 0x8b8   :  { %v2082_v1 = vpop.permute.xlu1 %2081 }
 0x8bd   :  { %v3029_v16 = vpop.permute.xlu0 %3028  ;;  %v3034_v13 = vpop.permute.xlu1 %3033 }
 0x8be   :  { %v3031_v39 = vunpack.i.h.bf16 %v3029_v16  ;;  %v3030_v10 = vunpack.i.l.bf16 %v3029_v16  ;;  %v3035_v2 = vunpack.i.l.bf16 %v3034_v13  ;;  %v3036_v15 = vunpack.i.h.bf16 %v3034_v13 }
 0x8c0   :  { %v2084_v38 = vsel %vm1138_vm0, %v2047_v5, %v3030_v10  ;;  %v1139_v55 = vsel %vm1138_vm0, %v1101_v53, %v3031_v39 }
 0x8c1   :  { %v2085_v37 = vsel %vm778_vm14, %v2084_v38, %v3035_v2  ;;  %v2074_v14 = vpop.permute.xlu0 %2073  ;;  %v1136_v51 = vpop.permute.xlu1 %1135  ;;  %v1140_v21 = vsel %vm778_vm14, %v1139_v55, %v3036_v15  ;;  %vm3074_vm14 = vmmov 0  }
 0x8c2   :  { %v2086_v41 = vsel %vm1141_vm1, %v2085_v37, %v2074_v14  ;;  %v2087_v6 = vsel %vm781_vm15, %v2074_v14, %v2082_v1  ;;  %2651 = vmatprep.mubr.msk.f32.mxu1 %vm3074_vm14, %v3075_v45 }
 0x8c3   :  { %v2090_v11 = vrot.slane %v2086_v41, 7  ;;  %v2091_v63 = vrot.slane %v2087_v6, 7 }
 0x8c5   :  { %v1128_v27 = vpop.permute.xlu0 %1127 }
 0x8c6   :  { %v1142_v19 = vsel %vm1141_vm1, %v1140_v21, %v1128_v27  ;;  %v1143_v20 = vsel %vm781_vm15, %v1128_v27, %v1136_v51  ;;  %vm2223_vm15 = vcmask 1041408  }
 0x8c7   :  { %v2096_v26 = vsel %vm2094_vm9, %v1143_v20, %v2091_v63  ;;  %v2095_v28 = vsel %vm2094_vm9, %v1142_v19, %v2090_v11  ;;  %2650 = vmatpush3.msk.msra.mxu1 %vm2223_vm15, %v2211_v4 }
 0x8c8   :  { %2403 = vmatprep.mubr.msk.f32.mxu0 %vm2126_vm5, %v2096_v26 }
 0x8c9   :  { %2199 = vmatmul.mubr.f32.vlgmr.msra.gmra.mrb[22].mxu0 %v2095_v28 }
 0x99c   :  { %v2200_v25 = vpop.f32.mrb[22].mxu0 }
 0x99d   :  { %v2201_v49 = vadd.f32 %v2401_v54, %v2200_v25  ;;  %v2202_v36 = vpop.f32.mrb[23].mxu0 }
 0x99f   :  { %v2204_v7 = vmax.f32 %v2201_v49, 0.0 }
 0x9a1   :  { %2652 = vmatmul.mubr.msk.f32.vlgmr.msra.gmra.mrb[26].mxu1 %vm2219_vm6, %v2204_v7 }
 0xa74   :  { %v2293_v56 = vpop.f32.mrb[26].mxu1 }
 0xa75   :  { %v2294_v8 = vadd.f32 %v2404_v18, %v2293_v56  ;;  %v2653_v22 = vpop.f32.mrb[27].mxu1 }
 0xa77   :  { %2297 = vst [vmem:[#allocation2] sm:$0x3] %v2294_v8 }
 0xa78   :  { %3048 = shalt.err (!%p3045_p4)
}
 0xa79   :  { %s3049_s28 = scalar_lea.hbm %s4416_s11, 32 }
 0xa7a   :  { %p3050_p5 = scmp.ne.s32.totalorder %s4416_s11, %s3049_s28  ;;  %p3053_p6 = scmp.lt.u32.totalorder %s3049_s28, %s4416_s11 }
 0xa7c   :  { %p3055_p7 = pnand %p3053_p6, %p3050_p5 }
 0xa7e   :  { %3058 = shalt.err (!%p3055_p7)
}
 0xa7f   :  { %2307 = dma.vmem_to_hbm [thread:$0]  %s2305_s26, 32, %s4416_s11, [#allocation3]  }
 0xa80   :  { %3059 = dma.done.wait [#allocation3], 32  }
 0xa81   :  { %3060 = vsyncadd [#allocation3], 4294967264 }
 0xa82   :  { %2311 = vsyncpa [#allocation3], 1 }

</bundles_post_ra>
